<compile_context>
chip_gen: v5e
topology: v5e:2x2
jax: 0.10.0
libtpu: 0.0.40
codegen_flags: <defaults>
</compile_context>

<pallas_src>
import jax
import jax.numpy as jnp
import numpy as np
from jax.experimental import pallas as pl
from jax.experimental.pallas import tpu as pltpu


def _round_up(a, b):
    return ((a + b - 1) // b) * b


# ---------------------------------------------------------------------------
# Kernel: tiled GEMM + low-rank LoRA branch, fp32 VMEM accumulators.
#   k==0      : acc <- broadcast(bias), dacc <- 0
#   every k   : acc += X @ W_main ;  dacc += X @ W_down
#   k==last   : out <- acc + dacc @ (scale*W_up)
# ---------------------------------------------------------------------------
def _lora_conv_gemm_kernel(x_ref, wm_ref, wd_ref, wu_ref, b_ref, o_ref,
                           acc_ref, dacc_ref):
    k = pl.program_id(2)

    @pl.when(k == 0)
    def _():
        acc_ref[...] = jnp.broadcast_to(b_ref[...], acc_ref.shape).astype(jnp.float32)
        dacc_ref[...] = jnp.zeros_like(dacc_ref)

    x = x_ref[...]
    acc_ref[...] += jnp.dot(x, wm_ref[...], preferred_element_type=jnp.float32)
    dacc_ref[...] += jnp.dot(x, wd_ref[...], preferred_element_type=jnp.float32)

    @pl.when(k == pl.num_programs(2) - 1)
    def _():
        lora = jnp.dot(dacc_ref[...].astype(wu_ref.dtype), wu_ref[...],
                       preferred_element_type=jnp.float32)
        o_ref[...] = (acc_ref[...] + lora).astype(o_ref.dtype)


def lora_injected_conv2d(x, w_main, b_main, w_down, w_up, *,
                         stride=1, padding=0, dilation=1, scale=1.0,
                         tm=None, compute_dtype=jnp.bfloat16):
    """x: (N, C_in, H, W) NCHW.  Returns (N, C_out, OH, OW)."""
    N, Cin, H, W = x.shape
    Cout, _, kh, kw = w_main.shape
    r = w_down.shape[0]

    OH = (H + 2 * padding - dilation * (kh - 1) - 1) // stride + 1
    OW = (W + 2 * padding - dilation * (kw - 1) - 1) // stride + 1
    M = N * OH * OW
    K = Cin * kh * kw

    # ---- tile selection -----------------------------------------------------
    # tn: never 128 (half-width MXU on v6e/v7x, doubles X re-reads); 512 when
    # Cout is large enough that it doesn't inflate C_pad.
    tn = 512 if Cout > 256 else 256
    C_pad = _round_up(Cout, tn)
    grid_n = C_pad // tn

    # tk: deep accumulation chains; pick from {512,384,256} minimizing zero-pad.
    # Only tiny K (<= 256 after lane alignment) collapses to a single small step.
    K128 = _round_up(K, 128)
    if K128 <= 256:
        tk, K_pad = K128, K128
    else:
        tk, K_pad = 512, _round_up(K, 512)
        for cand in (384, 256):
            kp = _round_up(K, cand)
            if kp < K_pad:
                tk, K_pad = cand, kp

    # tm: large to amortize per-grid-step overhead and cut W re-reads; shrink
    # for small problems so both v7x TensorCores get a parallel tile.
    if tm is None:
        tm = 1024 if M >= 4096 else 512
    tm = max(8, _round_up(min(tm, _round_up(M, 8)), 8))
    if pl.cdiv(M, tm) * grid_n < 2 and M > 8:
        tm = max(8, _round_up(pl.cdiv(M, 2), 8))
    grid_m = pl.cdiv(M, tm)
    grid = (grid_m, grid_n, K_pad // tk)

    R_pad = _round_up(r, 128)  # LoRA rank padded to one lane group

    # ---- weights (prepared in fp32, then narrowed) --------------------------
    # K ordering is (kh, kw, Cin) to match the lane-contiguous im2col below.
    wm = jnp.transpose(w_main.astype(jnp.float32), (2, 3, 1, 0)).reshape(K, Cout)
    wd = jnp.transpose(w_down.astype(jnp.float32), (2, 3, 1, 0)).reshape(K, r)
    wu = w_up.astype(jnp.float32).reshape(Cout, r).T * jnp.float32(scale)  # (r, Cout)
    bias = (jnp.zeros((Cout,), jnp.float32) if b_main is None
            else b_main.astype(jnp.float32)).reshape(1, Cout)

    Wm = jnp.pad(wm, ((0, K_pad - K), (0, C_pad - Cout))).astype(compute_dtype)
    Wd = jnp.pad(wd, ((0, K_pad - K), (0, R_pad - r))).astype(compute_dtype)
    Wu = jnp.pad(wu, ((0, R_pad - r), (0, C_pad - Cout))).astype(compute_dtype)
    bias = jnp.pad(bias, ((0, 0), (0, C_pad - Cout)))

    # ---- im2col, built directly in the K-padded layout (one materialization) -
    x_nhwc = jnp.transpose(x, (0, 2, 3, 1)).astype(compute_dtype)   # cast early
    xp = jnp.pad(x_nhwc, ((0, 0), (padding, padding), (padding, padding), (0, 0)))
    taps = []
    for i in range(kh):
        for j in range(kw):
            hi, wj = i * dilation, j * dilation
            taps.append(xp[:, hi:hi + stride * (OH - 1) + 1:stride,
                             wj:wj + stride * (OW - 1) + 1:stride, :])
    if K_pad > K:  # reduction axis needs true zeros; M axis is never padded
        taps.append(jnp.zeros((N, OH, OW, K_pad - K), compute_dtype))
    X = jnp.concatenate(taps, axis=-1).reshape(M, K_pad)             # (M, K_pad)

    # ---- pallas call ---------------------------------------------------------
    def _run(x_buffers):
        if x_buffers:
            x_spec = pl.BlockSpec((tm, tk), lambda i, j, k: (i, k),
                                  pipeline_mode=pl.Buffered(x_buffers))
        else:
            x_spec = pl.BlockSpec((tm, tk), lambda i, j, k: (i, k))
        return pl.pallas_call(
            _lora_conv_gemm_kernel,
            out_shape=jax.ShapeDtypeStruct((M, C_pad), x.dtype),
            grid_spec=pltpu.PrefetchScalarGridSpec(
                num_scalar_prefetch=0,
                grid=grid,
                in_specs=[
                    x_spec,                                                # X tile
                    pl.BlockSpec((tk, tn), lambda i, j, k: (k, j)),        # W_main
                    pl.BlockSpec((tk, R_pad), lambda i, j, k: (k, 0)),     # W_down
                    pl.BlockSpec((R_pad, tn), lambda i, j, k: (0, j)),     # W_up*scale
                    pl.BlockSpec((1, tn), lambda i, j, k: (0, j)),         # bias
                ],
                out_specs=pl.BlockSpec((tm, tn), lambda i, j, k: (i, j)),
                scratch_shapes=[pltpu.VMEM((tm, tn), jnp.float32),
                                pltpu.VMEM((tm, R_pad), jnp.float32)],
            ),
            compiler_params=pltpu.CompilerParams(
                dimension_semantics=("parallel", "parallel", "arbitrary"),
                vmem_limit_bytes=48 * 1024 * 1024,   # under v7x's 64 MiB physical
            ),
        )(X, Wm, Wd, Wu, bias)

    try:
        out = _run(3)     # triple-buffer X: hides X DMA when per-step compute is short
    except Exception:     # fallback for jax versions without BlockSpec.pipeline_mode
        out = _run(0)

    out = out[:, :Cout]                                            # drop C padding
    return out.reshape(N, OH, OW, Cout).transpose(0, 3, 1, 2)      # NCHW


# ---------------------------------------------------------------------------
# Pure-JAX reference (matches the PyTorch module in eval mode).
# ---------------------------------------------------------------------------
def _reference(x, w_main, b_main, w_down, w_up, *, stride, padding, dilation, scale):
    dn = jax.lax.conv_dimension_numbers(x.shape, w_main.shape,
                                        ("NCHW", "OIHW", "NCHW"))
    conv = lambda lhs, rhs, s, p, d: jax.lax.conv_general_dilated(
        lhs, rhs, (s, s), [(p, p), (p, p)], rhs_dilation=(d, d),
        dimension_numbers=dn)
    main = conv(x, w_main, stride, padding, dilation)
    if b_main is not None:
        main = main + b_main.reshape(1, -1, 1, 1)
    down = conv(x, w_down, stride, padding, dilation)
    up = jax.lax.conv_general_dilated(down, w_up, (1, 1), [(0, 0), (0, 0)],
                                      dimension_numbers=dn)
    return main + up * scale


if __name__ == "__main__":
    # Module hyperparameters (kept small).
    N, Cin, H, W = 2, 4, 16, 16
    Cout, kh, kw = 8, 3, 3
    stride, padding, dilation = 1, 1, 1
    r, scale = 4, 1.0

    key = jax.random.PRNGKey(0)
    kx, kwm, kb, kd, ku = jax.random.split(key, 5)

    x = jax.random.normal(kx, (N, Cin, H, W), jnp.float32)
    w_main = jax.random.normal(kwm, (Cout, Cin, kh, kw), jnp.float32) * 0.1
    b_main = jax.random.normal(kb, (Cout,), jnp.float32) * 0.1
    w_down = jax.random.normal(kd, (r, Cin, kh, kw), jnp.float32) * (1.0 / r)
    # Module zero-inits lora_up; use small random values so the LoRA path is
    # actually exercised (set to zeros to match fresh-init behaviour exactly).
    w_up = jax.random.normal(ku, (Cout, r, 1, 1), jnp.float32) * 0.05

    ref = _reference(x, w_main, b_main, w_down, w_up,
                     stride=stride, padding=padding, dilation=dilation, scale=scale)

    # fp32-operand run: tight check of im2col + low-rank branch semantics.
    out_f32 = lora_injected_conv2d(x, w_main, b_main, w_down, w_up,
                                   stride=stride, padding=padding,
                                   dilation=dilation, scale=scale,
                                   compute_dtype=jnp.float32)
    out_f32 = jax.block_until_ready(out_f32)
    np.testing.assert_allclose(np.asarray(out_f32), np.asarray(ref),
                               rtol=1e-3, atol=1e-3)

    # bf16-operand run (default, MXU-friendly): fp32 accumulation, looser tol.
    out_bf16 = lora_injected_conv2d(x, w_main, b_main, w_down, w_up,
                                    stride=stride, padding=padding,
                                    dilation=dilation, scale=scale)
    out_bf16 = jax.block_until_ready(out_bf16)
    np.testing.assert_allclose(np.asarray(out_bf16), np.asarray(ref),
                               rtol=5e-2, atol=5e-2)

    print("KERNEL_OK")
</pallas_src>

<mosaic_0001>
module attributes {stable_mosaic.version = 11 : i64} {
  func.func @_lora_conv_gemm_kernel(%arg0: i32, %arg1: i32, %arg2: i32, %arg3: memref<256x128xf32, #tpu.memory_space<vmem>>, %arg4: memref<128x256xf32, #tpu.memory_space<vmem>>, %arg5: memref<128x128xf32, #tpu.memory_space<vmem>>, %arg6: memref<128x256xf32, #tpu.memory_space<vmem>>, %arg7: memref<1x256xf32, #tpu.memory_space<vmem>>, %arg8: memref<256x256xf32, #tpu.memory_space<vmem>>, %arg9: memref<256x256xf32, #tpu.memory_space<vmem>>, %arg10: memref<256x128xf32, #tpu.memory_space<vmem>>) attributes {dimension_semantics = [#tpu.dimension_semantics<parallel>, #tpu.dimension_semantics<parallel>, #tpu.dimension_semantics<arbitrary>], iteration_bounds = array<i64: 2, 1, 1>, scalar_prefetch = 0 : i64, scratch_operands = 2 : i64, tpu.core_type = #tpu.core_type<tc>, window_params = [{transform_indices = @transform_0, window_bounds = array<i64: 256, 128>}, {transform_indices = @transform_1, window_bounds = array<i64: 128, 256>}, {transform_indices = @transform_2, window_bounds = array<i64: 128, 128>}, {transform_indices = @transform_3, window_bounds = array<i64: 128, 256>}, {transform_indices = @transform_4, window_bounds = array<i64: 1, 256>}, {transform_indices = @transform_5, window_bounds = array<i64: 256, 256>}]} {
    %c0_i32 = arith.constant 0 : i32
    %0 = arith.cmpi eq, %arg2, %c0_i32 : i32
    %1 = arith.extui %0 : i1 to i32
    %c0_i32_0 = arith.constant 0 : i32
    %2 = arith.cmpi ne, %1, %c0_i32_0 : i32
    scf.if %2 {
      %c0_17 = arith.constant 0 : index
      %c0_18 = arith.constant 0 : index
      %17 = vector.load %arg7[%c0_17, %c0_18] : memref<1x256xf32, #tpu.memory_space<vmem>>, vector<1x256xf32>
      %18 = vector.shape_cast %17 : vector<1x256xf32> to vector<1x256xf32>
      %19 = vector.broadcast %18 : vector<1x256xf32> to vector<256x256xf32>
      %c0_19 = arith.constant 0 : index
      %c0_20 = arith.constant 0 : index
      %20 = vector.load %arg9[%c0_19, %c0_20] : memref<256x256xf32, #tpu.memory_space<vmem>>, vector<256x256xf32>
      tpu.vector_store %arg9[%c0_19, %c0_20], %19 {strides = array<i32>} : memref<256x256xf32, #tpu.memory_space<vmem>>, vector<256x256xf32>,
      %cst_21 = arith.constant 0.000000e+00 : f32
      %21 = vector.broadcast %cst_21 : f32 to vector<256x128xf32>
      %c0_22 = arith.constant 0 : index
      %c0_23 = arith.constant 0 : index
      %22 = vector.load %arg10[%c0_22, %c0_23] : memref<256x128xf32, #tpu.memory_space<vmem>>, vector<256x128xf32>
      tpu.vector_store %arg10[%c0_22, %c0_23], %21 {strides = array<i32>} : memref<256x128xf32, #tpu.memory_space<vmem>>, vector<256x128xf32>,
    } else {
    }
    %c0 = arith.constant 0 : index
    %c0_1 = arith.constant 0 : index
    %3 = vector.load %arg3[%c0, %c0_1] : memref<256x128xf32, #tpu.memory_space<vmem>>, vector<256x128xf32>
    %c0_2 = arith.constant 0 : index
    %c0_3 = arith.constant 0 : index
    %4 = vector.load %arg9[%c0_2, %c0_3] : memref<256x256xf32, #tpu.memory_space<vmem>>, vector<256x256xf32>
    %c0_4 = arith.constant 0 : index
    %c0_5 = arith.constant 0 : index
    %5 = vector.load %arg4[%c0_4, %c0_5] : memref<128x256xf32, #tpu.memory_space<vmem>>, vector<128x256xf32>
    %cst = arith.constant dense<0.000000e+00> : vector<256x256xf32>
    %6 = tpu.matmul %3, %5, %cst {dimension_numbers = #tpu.dot_dimension_numbers<[1], [0], [0], [1], [0, 0, 1, 1], [], []>} : vector<256x128xf32>, vector<128x256xf32>, vector<256x256xf32> -> vector<256x256xf32>
    %7 = arith.addf %4, %6 : vector<256x256xf32>
    %c0_6 = arith.constant 0 : index
    %c0_7 = arith.constant 0 : index
    %8 = vector.load %arg9[%c0_6, %c0_7] : memref<256x256xf32, #tpu.memory_space<vmem>>, vector<256x256xf32>
    tpu.vector_store %arg9[%c0_6, %c0_7], %7 {strides = array<i32>} : memref<256x256xf32, #tpu.memory_space<vmem>>, vector<256x256xf32>,
    %c0_8 = arith.constant 0 : index
    %c0_9 = arith.constant 0 : index
    %9 = vector.load %arg10[%c0_8, %c0_9] : memref<256x128xf32, #tpu.memory_space<vmem>>, vector<256x128xf32>
    %c0_10 = arith.constant 0 : index
    %c0_11 = arith.constant 0 : index
    %10 = vector.load %arg5[%c0_10, %c0_11] : memref<128x128xf32, #tpu.memory_space<vmem>>, vector<128x128xf32>
    %cst_12 = arith.constant dense<0.000000e+00> : vector<256x128xf32>
    %11 = tpu.matmul %3, %10, %cst_12 {dimension_numbers = #tpu.dot_dimension_numbers<[1], [0], [0], [1], [0, 0, 1, 1], [], []>} : vector<256x128xf32>, vector<128x128xf32>, vector<256x128xf32> -> vector<256x128xf32>
    %12 = arith.addf %9, %11 : vector<256x128xf32>
    %c0_13 = arith.constant 0 : index
    %c0_14 = arith.constant 0 : index
    %13 = vector.load %arg10[%c0_13, %c0_14] : memref<256x128xf32, #tpu.memory_space<vmem>>, vector<256x128xf32>
    tpu.vector_store %arg10[%c0_13, %c0_14], %12 {strides = array<i32>} : memref<256x128xf32, #tpu.memory_space<vmem>>, vector<256x128xf32>,
    %c0_i32_15 = arith.constant 0 : i32
    %14 = arith.cmpi eq, %arg2, %c0_i32_15 : i32
    %15 = arith.extui %14 : i1 to i32
    %c0_i32_16 = arith.constant 0 : i32
    %16 = arith.cmpi ne, %15, %c0_i32_16 : i32
    scf.if %16 {
      %c0_17 = arith.constant 0 : index
      %c0_18 = arith.constant 0 : index
      %17 = vector.load %arg10[%c0_17, %c0_18] : memref<256x128xf32, #tpu.memory_space<vmem>>, vector<256x128xf32>
      %c0_19 = arith.constant 0 : index
      %c0_20 = arith.constant 0 : index
      %18 = vector.load %arg6[%c0_19, %c0_20] : memref<128x256xf32, #tpu.memory_space<vmem>>, vector<128x256xf32>
      %cst_21 = arith.constant dense<0.000000e+00> : vector<256x256xf32>
      %19 = tpu.matmul %17, %18, %cst_21 {dimension_numbers = #tpu.dot_dimension_numbers<[1], [0], [0], [1], [0, 0, 1, 1], [], []>} : vector<256x128xf32>, vector<128x256xf32>, vector<256x256xf32> -> vector<256x256xf32>
      %c0_22 = arith.constant 0 : index
      %c0_23 = arith.constant 0 : index
      %20 = vector.load %arg9[%c0_22, %c0_23] : memref<256x256xf32, #tpu.memory_space<vmem>>, vector<256x256xf32>
      %21 = arith.addf %20, %19 : vector<256x256xf32>
      %c0_24 = arith.constant 0 : index
      %c0_25 = arith.constant 0 : index
      %22 = vector.load %arg8[%c0_24, %c0_25] : memref<256x256xf32, #tpu.memory_space<vmem>>, vector<256x256xf32>
      tpu.vector_store %arg8[%c0_24, %c0_25], %21 {strides = array<i32>} : memref<256x256xf32, #tpu.memory_space<vmem>>, vector<256x256xf32>,
    } else {
    }
    return
  }
  func.func @transform_0(%arg0: i32, %arg1: i32, %arg2: i32) -> (i32, i32) {
    %c0_i32 = arith.constant 0 : i32
    return %arg0, %arg2 : i32, i32
  }
  func.func @transform_1(%arg0: i32, %arg1: i32, %arg2: i32) -> (i32, i32) {
    %c0_i32 = arith.constant 0 : i32
    return %arg2, %arg1 : i32, i32
  }
  func.func @transform_2(%arg0: i32, %arg1: i32, %arg2: i32) -> (i32, i32) {
    %c0_i32 = arith.constant 0 : i32
    %c0_i32_0 = arith.constant 0 : i32
    return %arg2, %c0_i32 : i32, i32
  }
  func.func @transform_3(%arg0: i32, %arg1: i32, %arg2: i32) -> (i32, i32) {
    %c0_i32 = arith.constant 0 : i32
    %c0_i32_0 = arith.constant 0 : i32
    return %c0_i32, %arg1 : i32, i32
  }
  func.func @transform_4(%arg0: i32, %arg1: i32, %arg2: i32) -> (i32, i32) {
    %c0_i32 = arith.constant 0 : i32
    %c0_i32_0 = arith.constant 0 : i32
    return %c0_i32, %arg1 : i32, i32
  }
  func.func @transform_5(%arg0: i32, %arg1: i32, %arg2: i32) -> (i32, i32) {
    %c0_i32 = arith.constant 0 : i32
    return %arg0, %arg1 : i32, i32
  }
}

</mosaic_0001>

<bundles_post_ra>
// kernel: tpu_custom_call.1
= control target key start
LH: loop header
LB: loop body
LE: loop exit
PB: predicated region body
PF: predicated region fallthrough
CT: control target
= control target key end

     0   :  { %s2860_s0 = inlined_call_operand.hbm [shape: f32[512,128], index: 0, kind: input, shape index: {}]   ;;  %s2861_s1 = inlined_call_operand.hbm [shape: f32[128,256], index: 1, kind: input, shape index: {}]   ;;  %s2862_s2 = inlined_call_operand.hbm [shape: f32[128,128], index: 2, kind: input, shape index: {}]   ;;  %s2863_s3 = inlined_call_operand.hbm [shape: f32[128,256], index: 3, kind: input, shape index: {}]   ;;  %s2864_s4 = inlined_call_operand.vmem [shape: f32[1,256], index: 4, kind: input, shape index: {}]   ;;  %s2865_s5 = inlined_call_operand.hbm [shape: f32[512,256], index: 5, kind: output, shape index: {}]  }
   0x1   :  { %2868 = sst [smem:[#allocation17_spill]] %s2861_s1 }
   0x2   :  { %2869 = sst [smem:[#allocation18_spill]] %s2862_s2 }
   0x3   :  { %2870 = sst [smem:[#allocation19_spill]] %s2863_s3 }
   0x4   :  { %10 = vsyncpa [#allocation5], 0 }
   0x5   :  { %12 = vsyncpa [#allocation5 + $0x1], 0 }
   0x6   :  { %13 = vsyncpa [#allocation8], 0 }
   0x7   :  { %14 = vsyncpa [#allocation11], 0 }
   0x8   :  { %15 = vsyncpa [#allocation6], 0 }
   0x9   :  { %17 = vsyncpa [#allocation6 + $0x1], 0  ;;  %s2254_s18 = smov 0   ;;  %s2256_s19 = smov 0  }
   0xa   :  { %s2258_s20 = smov 0   ;;  %s2260_s21 = smov 0  }
   0xb   :  { %s2262_s22 = smov 0   ;;  %s2264_s23 = smov 0  }
   0xc LB: > { %s1830_s24 = sadd.s32 4294967295, %s2213_s23   ;;  %s1831_s25 = sadd.s32 4294967294, %s2213_s23   ;;  %s2213_s23 = sphi %s2264_s23, %s23_s23   ;;  %s2209_s22 = sphi %s2262_s22, %s2888_s22   ;;  %s2205_s21 = sphi %s2260_s21, %s2887_s21   ;;  %s2201_s20 = sphi %s2258_s20, %s2886_s20   ;;  %s2197_s19 = sphi %s2256_s19, %s2885_s19   ;;  %s2193_s18 = sphi %s2254_s18, %s2884_s18  }
   0xd   : > { %p64_p0 = scmp.ne.s32.totalorder %s2197_s19, %s2193_s18  ;;  %p2288_p1 = scmp.eq.s32.totalorder %s1830_s24, 0 }
   0xe   : > { %p2292_p2 = scmp.eq.s32.totalorder %s1830_s24, 1  ;;  %p202_p3 = scmp.eq.s32.totalorder %s1831_s25, 1 }
   0xf   : > { %p2298_p4 = por %p2288_p1, %p64_p0  ;;  %p1832_p5 = scmp.ge.s32.totalorder %s2213_s23, 1 }
  0x10   : > { %p2303_p6 = por %p202_p3, %p64_p0  ;;  %p209_p7 = scmp.lt.s32.totalorder %s2213_s23, 3 }
  0x11   : > { %s2875_s1 = sld [smem:[#allocation17_spill]]  ;;  %s2215_s9 = smov [#allocation7]  }
  0x12   : > { %p2311_p8 = pnand %p1832_p5, %p209_p7  ;;  %s228_s10 = sshll.u32 %s2215_s9, 4  ;;  %s229_s10 = int_to_ptr.vmem [resolvable:$true] %s228_s10 }
  0x13   : > { %p1837_p11 = scmp.ge.s32.totalorder %s2213_s23, 2  ;;  %s2878_s2 = sld [smem:[#allocation18_spill]] }
  0x14   : > { %p1920_p9 = pneg %p2311_p8  ;;  %s2216_s15 = smov 256  }
  0x15   : > { %s2217_s16 = smov 16   ;;  %s2218_s17 = smov [#allocation9]  }
  0x16   : > { %p2319_p10 = pnand %p1920_p9, %p2288_p1  ;;  %s245_s24 = sshll.u32 %s2218_s17, 4  ;;  %s246_s24 = int_to_ptr.vmem [resolvable:$true] %s245_s24 }
  0x17   : > { %s226_s7 = sshll.u32 %s2875_s1, 4  ;;  %s2866_s25 = smov 128   ;;  %s227_s7 = int_to_ptr.hbm [resolvable:$true] %s226_s7 }
  0x18   : > { %1923 = dma.hbm_to_vmem [thread:$0]  (!%p2319_p10), %s227_s7, 4096, %s229_s10, [#allocation8], %s2216_s15, %s2216_s15, %s2217_s16  }
  0x19   : > { %s243_s14 = sshll.u32 %s2878_s2, 4  ;;  %s2867_s30 = smov 8   ;;  %s244_s14 = int_to_ptr.hbm [resolvable:$true] %s243_s14 }
  0x1a   : > { %1926 = dma.hbm_to_vmem [thread:$0]  (!%p2319_p10), %s244_s14, 2048, %s246_s24, [#allocation8], %s2866_s25, %s2866_s25, %s2867_s30  }
  0x1b   : > { %s2879_s3 = sld [smem:[#allocation19_spill]]  ;;  %s2221_s7 = smov [#allocation10]  }
  0x1c   : > { %s262_s10 = sshll.u32 %s2221_s7, 4  ;;  %s51_s13 = sadd.s32 1, %s2201_s20  ;;  %s263_s10 = int_to_ptr.vmem [resolvable:$true] %s262_s10 }
  0x1d   : > { %s42_s17 = sadd.s32 1, %s2209_s22  ;;  %p58_p12 = scmp.ne.s32.totalorder %s2201_s20, %s2197_s19 }
  0x1e   : > { %p44_p13 = scmp.ge.s32.totalorder %s42_s17, 2  ;;  %p59_p0 = scmp.eq.s32.totalorder %s2213_s23, 0 }
  0x1f   : > { %p2346_p3 = por %p2292_p2, %p58_p12  ;;  %p1941_p5 = scmp.lt.s32.totalorder %s2213_s23, 2 }
  0x20   : > { %s2890_s17 = smov (%p44_p13, %s42_s17), 0  ;;  %p2353_p7 = por %p59_p0, %p58_p12 }
  0x21   : > { %s260_s12 = sshll.u32 %s2879_s3, 4  ;;  %s284_s11 = sand.u32 1, %s2201_s20   ;;  %s261_s12 = int_to_ptr.hbm [resolvable:$true] %s260_s12 }
  0x22   : > { %1929 = dma.hbm_to_vmem [thread:$0]  (!%p2319_p10), %s261_s12, 4096, %s263_s10, [#allocation11], %s2216_s15, %s2216_s15, %s2217_s16  }
  0x23   : > { %s46_s15 = ssub.s32 %s2209_s22, %s2890_s17  ;;  %s1838_s16 = sshll.u32 %s284_s11, 8 }
  0x24   : > { %p49_p9 = scmp.eq.s32.totalorder %s46_s15, 0  ;;  %s1853_s6 = sshll.u32 %s2209_s22, 8 }
  0x25   : > { %s294_s7 = scalar_lea.hbm %s2860_s0, %s1853_s6  ;;  %s288_s10 = scalar_lea.vmem [#allocation4], %s1838_s16 }
  0x26   : > { %s2362_s27 = scalar_select %p49_p9, %s2201_s20, %s51_s13  }
  0x27   : > { %s297_s25 = sshll.u32 %s288_s10, 4  ;;  %s295_s30 = sshll.u32 %s294_s7, 4  ;;  %s298_s25 = int_to_ptr.vmem [resolvable:$true] %s297_s25  ;;  %s296_s30 = int_to_ptr.hbm [resolvable:$true] %s295_s30 }
  0x28   : > { %p1931_p2 = pnand %p1941_p5, %p2353_p7  ;;  %s285_s1 = scalar_lea.sflag [#allocation5], %s284_s11 }
  0x29   : > { %s2882_s2 = smov 8   ;;  %s2883_s3 = smov 128  }
  0x2a   : > { %1933 = dma.hbm_to_vmem [thread:$0]  (!%p1931_p2), %s296_s30, 4096, %s298_s25, %s285_s1, %s2883_s3, %s2883_s3, %s2882_s2  }
  0x2b   : > { %309 = sbr.rel (%p2311_p8) target bundleno = 667 (0x29b), region = 40  ;;  %s2377_s13 = sand.u32 (!%p2311_p8), 1, %s2197_s19  }
  0x2c   : > { %s1842_s15 = sshll.u32 (!%p2311_p8), %s2377_s13, 8  ;;  %s312_s16 = scalar_lea.sflag (!%p2311_p8), [#allocation5], %s2377_s13 }
  0x2d   : > { %s2381_s6 = scalar_lea.vmem (!%p2311_p8), [#allocation4], %s1842_s15 }
  0x30   : > { %2176 = dma.done.wait (%p2298_p4), %s312_s16, 4096  }
  0x31   : > { %2178 = vsyncadd (%p2298_p4), %s312_s16, 4294963200 }
  0x32   : > { %2180 = dma.done.wait (%p2288_p1), [#allocation8], 6144  }
  0x33   : > { %2182 = vsyncadd (%p2288_p1), [#allocation8], 4294961152 }
  0x34   : > { %2184 = dma.done.wait (%p2288_p1), [#allocation11], 4096  }
  0x35   : > { %2186 = vsyncadd (%p2288_p1), [#allocation11], 4294963200  ;;  %v606_v0 = vld [vmem:[#allocation7 + $0xf0] sm:$0xff]  ;;  %v604_v1 = vld [vmem:[#allocation7 + $0xe0] sm:$0xff]  ;;  %s1846_s3 = sshll.u32 %s2377_s13, 9  ;;  %s1855_s28 = sshll.u32 %s2205_s21, 9 }
  0x36   : > { %1857 = vmatpush.msra.mxu2 %v606_v0  ;;  %1856 = vmatpush.msra.mxu1 %v606_v0  ;;  %v602_v2 = vld [vmem:[#allocation7 + $0xd0] sm:$0xff]  ;;  %v600_v3 = vld [vmem:[#allocation7 + $0xc0] sm:$0xff]  ;;  %v1009_v17 = vld [vmem:[#allocation9 + $0x78] sm:$0xff]  ;;  %s2649_s26 = scalar_lea.vmem [#allocation12], %s1846_s3  ;;  %s1687_s30 = scalar_lea.hbm %s2865_s5, %s1855_s28 }
  0x37   : > { %608 = vmatpush.msra.mxu0 %v606_v0  ;;  %1858 = vmatpush.msra.mxu3 %v606_v0  ;;  %v598_v4 = vld [vmem:[#allocation7 + $0xb0] sm:$0xff]  ;;  %v596_v5 = vld [vmem:[#allocation7 + $0xa0] sm:$0xff]  ;;  %v1007_v19 = vld [vmem:[#allocation9 + $0x68] sm:$0xff]  ;;  %s1688_s24 = sshll.u32 %s2649_s26, 4  ;;  %s1690_s11 = sshll.u32 %s1687_s30, 4  ;;  %s1689_s24 = int_to_ptr.vmem [resolvable:$true] %s1688_s24  ;;  %s1691_s11 = int_to_ptr.hbm [resolvable:$true] %s1690_s11 }
  0x38   : > { %1860 = vmatpush.msra.mxu2 %v604_v1  ;;  %1859 = vmatpush.msra.mxu1 %v604_v1  ;;  %v594_v6 = vld [vmem:[#allocation7 + $0x90] sm:$0xff]  ;;  %v592_v7 = vld [vmem:[#allocation7 + $0x80] sm:$0xff]  ;;  %v2400_v21 = vld [vmem:[%s2381_s6 + $0x88] sm:$0xff]  ;;  %s1673_s21 = scalar_lea.sflag [#allocation6], %s2377_s13  ;;  %s2137_s9 = sshra.s32 %s1691_s11, 4  ;;  %s2138_s9 = int_to_ptr.hbm [resolvable:$true] %s2137_s9 }
  0x39   : > { %609 = vmatpush.msra.mxu0 %v604_v1  ;;  %1861 = vmatpush.msra.mxu3 %v604_v1  ;;  %v590_v8 = vld [vmem:[#allocation7 + $0x70] sm:$0xff]  ;;  %v588_v9 = vld [vmem:[#allocation7 + $0x60] sm:$0xff]  ;;  %v1005_v22 = vld [vmem:[#allocation9 + $0x58] sm:$0xff]  ;;  %s2139_s12 = scalar_lea.hbm %s2138_s9, 512  ;;  %s2143_s15 = scalar_lea.hbm %s2865_s5, 1024 }
  0x3a   : > { %1863 = vmatpush.msra.mxu2 %v602_v2  ;;  %1862 = vmatpush.msra.mxu1 %v602_v2  ;;  %v586_v10 = vld [vmem:[#allocation7 + $0x50] sm:$0xff]  ;;  %v584_v11 = vld [vmem:[#allocation7 + $0x40] sm:$0xff]  ;;  %v1003_v24 = vld [vmem:[#allocation9 + $0x48] sm:$0xff]  ;;  %p2140_p1 = scmp.ne.s32.totalorder %s2138_s9, %s2139_s12  ;;  %p2144_p10 = scmp.lt.s32.totalorder %s2138_s9, %s2865_s5 }
  0x3b   : > { %610 = vmatpush.msra.mxu0 %v602_v2  ;;  %1864 = vmatpush.msra.mxu3 %v602_v2  ;;  %v582_v12 = vld [vmem:[#allocation7 + $0x30] sm:$0xff]  ;;  %v580_v13 = vld [vmem:[#allocation7 + $0x20] sm:$0xff]  ;;  %v1001_v27 = vld [vmem:[#allocation9 + $0x38] sm:$0xff]  ;;  %p2145_p12 = scmp.lt.s32.totalorder %s2143_s15, %s2139_s12 }
  0x3c   : > { %1866 = vmatpush.msra.mxu2 %v600_v3  ;;  %1865 = vmatpush.msra.mxu1 %v600_v3  ;;  %v578_v14 = vld [vmem:[#allocation7 + $0x10] sm:$0xff]  ;;  %v576_v15 = vld [vmem:[#allocation7] sm:$0xff]  ;;  %v999_v29 = vld [vmem:[#allocation9 + $0x28] sm:$0xff]  ;;  %p2141_p4 = pnand %p2140_p1, %p2346_p3 }
  0x3d   : > { %611 = vmatpush.msra.mxu0 %v600_v3  ;;  %1867 = vmatpush.msra.mxu3 %v600_v3  ;;  %v2396_v16 = vld [vmem:[%s2381_s6 + $0x80] sm:$0xff]  ;;  %v1008_v18 = vld [vmem:[#allocation9 + $0x70] sm:$0xff]  ;;  %v2408_v31 = vld [vmem:[%s2381_s6 + $0x98] sm:$0xff]  ;;  %p2146_p13 = por %p2145_p12, %p2144_p10 }
  0x3e   : > { %1869 = vmatpush.msra.mxu2 %v598_v4  ;;  %1868 = vmatpush.msra.mxu1 %v598_v4  ;;  %v1006_v20 = vld [vmem:[#allocation9 + $0x60] sm:$0xff]  ;;  %v1004_v23 = vld [vmem:[#allocation9 + $0x50] sm:$0xff]  ;;  %v997_v32 = vld [vmem:[#allocation9 + $0x18] sm:$0xff]  ;;  %p2142_p8 = pneg %p2141_p4 }
  0x3f   : > { %612 = vmatpush.msra.mxu0 %v598_v4  ;;  %1870 = vmatpush.msra.mxu3 %v598_v4  ;;  %v1002_v25 = vld [vmem:[#allocation9 + $0x40] sm:$0xff]  ;;  %v2404_v26 = vld [vmem:[%s2381_s6 + $0x90] sm:$0xff]  ;;  %v995_v35 = vld [vmem:[#allocation9 + $0x8] sm:$0xff] }
  0x40   : > { %1872 = vmatpush.msra.mxu2 %v596_v5  ;;  %1871 = vmatpush.msra.mxu1 %v596_v5  ;;  %v1000_v28 = vld [vmem:[#allocation9 + $0x30] sm:$0xff]  ;;  %v998_v30 = vld [vmem:[#allocation9 + $0x20] sm:$0xff]  ;;  %v2420_v38 = vld [vmem:[%s2381_s6 + $0x8] sm:$0xff]  ;;  %p2147_p0 = pnand %p2146_p13, %p2142_p8 }
  0x41   : > { %613 = vmatpush.msra.mxu0 %v596_v5  ;;  %1873 = vmatpush.msra.mxu3 %v596_v5  ;;  %v996_v33 = vld [vmem:[#allocation9 + $0x10] sm:$0xff]  ;;  %v2412_v34 = vld [vmem:[%s2381_s6] sm:$0xff]  ;;  %v2424_v39 = vld [vmem:[%s2381_s6 + $0xa8] sm:$0xff] }
  0x42   : > { %1875 = vmatpush.msra.mxu2 %v594_v6  ;;  %1874 = vmatpush.msra.mxu1 %v594_v6  ;;  %v994_v36 = vld [vmem:[#allocation9] sm:$0xff]  ;;  %v2428_v40 = vld [vmem:[%s2381_s6 + $0x10] sm:$0xff]  ;;  %v2436_v42 = vld [vmem:[%s2381_s6 + $0x18] sm:$0xff] }
  0x43   : > { %614 = vmatpush.msra.mxu0 %v594_v6  ;;  %1876 = vmatpush.msra.mxu3 %v594_v6  ;;  %v2416_v37 = vld [vmem:[%s2381_s6 + $0xa0] sm:$0xff]  ;;  %v2432_v41 = vld [vmem:[%s2381_s6 + $0xb0] sm:$0xff]  ;;  %v2440_v43 = vld [vmem:[%s2381_s6 + $0xb8] sm:$0xff] }
  0x44   : > { %1878 = vmatpush.msra.mxu2 %v592_v7  ;;  %1877 = vmatpush.msra.mxu1 %v592_v7  ;;  %v2444_v44 = vld [vmem:[%s2381_s6 + $0x20] sm:$0xff]  ;;  %v2449_v45 = vld [vmem:[%s2381_s6 + $0x28] sm:$0xff]  ;;  %v2454_v46 = vld [vmem:[%s2381_s6 + $0x30] sm:$0xff] }
  0x45   : > { %615 = vmatpush.msra.mxu0 %v592_v7  ;;  %1879 = vmatpush.msra.mxu3 %v592_v7  ;;  %v2459_v47 = vld [vmem:[%s2381_s6 + $0x38] sm:$0xff]  ;;  %v2464_v48 = vld [vmem:[%s2381_s6 + $0x40] sm:$0xff]  ;;  %v1252_v50 = vld [vmem:[#allocation10 + $0xf0] sm:$0xff] }
  0x46   : > { %1881 = vmatpush.msra.mxu2 %v590_v8  ;;  %1880 = vmatpush.msra.mxu1 %v590_v8  ;;  %v2469_v49 = vld [vmem:[%s2381_s6 + $0xc0] sm:$0xff]  ;;  %v607_v51 = vld [vmem:[#allocation7 + $0xf8] sm:$0xff]  ;;  %v2473_v52 = vld [vmem:[%s2381_s6 + $0x48] sm:$0xff] }
  0x47   : > { %616 = vmatpush.msra.mxu0 %v590_v8  ;;  %1882 = vmatpush.msra.mxu3 %v590_v8  ;;  %v1250_v53 = vld [vmem:[#allocation10 + $0xe0] sm:$0xff]  ;;  %v1253_v54 = vld [vmem:[#allocation10 + $0xf8] sm:$0xff]  ;;  %v2478_v55 = vld [vmem:[%s2381_s6 + $0xc8] sm:$0xff] }
  0x48   : > { %1884 = vmatpush.msra.mxu2 %v588_v9  ;;  %1883 = vmatpush.msra.mxu1 %v588_v9  ;;  %v605_v56 = vld [vmem:[#allocation7 + $0xe8] sm:$0xff]  ;;  %v1248_v57 = vld [vmem:[#allocation10 + $0xd0] sm:$0xff]  ;;  %v603_v59 = vld [vmem:[#allocation7 + $0xd8] sm:$0xff] }
  0x49   : > { %617 = vmatpush.msra.mxu0 %v588_v9  ;;  %1885 = vmatpush.msra.mxu3 %v588_v9  ;;  %v1251_v58 = vld [vmem:[#allocation10 + $0xe8] sm:$0xff]  ;;  %v2482_v60 = vld [vmem:[%s2381_s6 + $0x50] sm:$0xff]  ;;  %v1246_v61 = vld [vmem:[#allocation10 + $0xc0] sm:$0xff] }
  0x4a   : > { %1887 = vmatpush.msra.mxu2 %v586_v10  ;;  %1886 = vmatpush.msra.mxu1 %v586_v10  ;;  %v1249_v62 = vld [vmem:[#allocation10 + $0xd8] sm:$0xff]  ;;  %v2487_v63 = vld [vmem:[%s2381_s6 + $0xd0] sm:$0xff]  ;;  %v601_v0 = vld [vmem:[#allocation7 + $0xc8] sm:$0xff] }
  0x4b   : > { %618 = vmatpush.msra.mxu0 %v586_v10  ;;  %1888 = vmatpush.msra.mxu3 %v586_v10  ;;  %v1244_v1 = vld [vmem:[#allocation10 + $0xb0] sm:$0xff]  ;;  %v1247_v2 = vld [vmem:[#allocation10 + $0xc8] sm:$0xff]  ;;  %v599_v3 = vld [vmem:[#allocation7 + $0xb8] sm:$0xff] }
  0x4c   : > { %1890 = vmatpush.msra.mxu2 %v584_v11  ;;  %1889 = vmatpush.msra.mxu1 %v584_v11  ;;  %v2491_v4 = vld [vmem:[%s2381_s6 + $0x58] sm:$0xff]  ;;  %v1242_v5 = vld [vmem:[#allocation10 + $0xa0] sm:$0xff]  ;;  %v597_v8 = vld [vmem:[#allocation7 + $0xa8] sm:$0xff] }
  0x4d   : > { %619 = vmatpush.msra.mxu0 %v584_v11  ;;  %1891 = vmatpush.msra.mxu3 %v584_v11  ;;  %v1245_v6 = vld [vmem:[#allocation10 + $0xb8] sm:$0xff]  ;;  %v1240_v9 = vld [vmem:[#allocation10 + $0x90] sm:$0xff]  ;;  %v1243_v10 = vld [vmem:[#allocation10 + $0xa8] sm:$0xff] }
  0x4e   : > { %1893 = vmatpush.msra.mxu2 %v582_v12  ;;  %1892 = vmatpush.msra.mxu1 %v582_v12  ;;  %v2496_v7 = vld [vmem:[%s2381_s6 + $0xd8] sm:$0xff] }
  0x4f   : > { %620 = vmatpush.msra.mxu0 %v582_v12  ;;  %1894 = vmatpush.msra.mxu3 %v582_v12  ;;  %v595_v11 = vld [vmem:[#allocation7 + $0x98] sm:$0xff]  ;;  %v2500_v12 = vld [vmem:[%s2381_s6 + $0x60] sm:$0xff] }
  0x50   : > { %1896 = vmatpush.msra.mxu2 %v580_v13  ;;  %1895 = vmatpush.msra.mxu1 %v580_v13 }
  0x51   : > { %621 = vmatpush.msra.mxu0 %v580_v13  ;;  %1897 = vmatpush.msra.mxu3 %v580_v13  ;;  %v1238_v13 = vld [vmem:[#allocation10 + $0x80] sm:$0xff] }
  0x52   : > { %1899 = vmatpush.msra.mxu2 %v578_v14  ;;  %1898 = vmatpush.msra.mxu1 %v578_v14 }
  0x53   : > { %622 = vmatpush.msra.mxu0 %v578_v14  ;;  %1900 = vmatpush.msra.mxu3 %v578_v14  ;;  %v1241_v14 = vld [vmem:[#allocation10 + $0x98] sm:$0xff] }
  0x54   : > { %1902 = vmatpush.msra.mxu2 %v576_v15  ;;  %1901 = vmatpush.msra.mxu1 %v576_v15 }
  0x55   : > { %672 = vmatmul.f32.vlgmr.msra.gmra.mxu2 %v2396_v16  ;;  %623 = vmatpush.msra.mxu0 %v576_v15 }
  0x56   : > { %1010 = vmatpush.msrb.mxu2 %v1009_v17  ;;  %1903 = vmatpush.msra.mxu3 %v576_v15  ;;  %v2507_v17 = vld [vmem:[%s2381_s6 + $0xe0] sm:$0xff] }
  0x57   : > { %624 = vmatmul.f32.vlgmr.msra.gmra.mxu0 %v2412_v34  ;;  %648 = vmatmul.f32.vlgmr.msra.gmra.mxu1 %v2464_v48 }
  0x58   : > { %1011 = vmatpush.msrb.mxu2 %v1008_v18  ;;  %696 = vmatmul.f32.vlgmr.msra.gmra.mxu3 %v2469_v49  ;;  %v593_v18 = vld [vmem:[#allocation7 + $0x88] sm:$0xff] }
  0x59   : > { %1254 = vmatpush.msrb.mxu3 %v1252_v50  ;;  %721 = vmatpush.msrb.mxu1 %v607_v51  ;;  %v1233_v50 = vld [vmem:[#allocation10 + $0x58] sm:$0xff] }
  0x5a   : > { %1012 = vmatpush.msrb.mxu2 %v1007_v19  ;;  %1367 = vmatpush.msrb.mxu0 %v1253_v54  ;;  %v1236_v19 = vld [vmem:[#allocation10 + $0x70] sm:$0xff]  ;;  %v585_v54 = vld [vmem:[#allocation7 + $0x48] sm:$0xff] }
  0x5b   : > { %1255 = vmatpush.msrb.mxu3 %v1250_v53  ;;  %722 = vmatpush.msrb.mxu1 %v605_v56  ;;  %v2529_v53 = vld [vmem:[%s2381_s6 + $0xf0] sm:$0xff] }
  0x5c   : > { %1013 = vmatpush.msrb.mxu2 %v1006_v20  ;;  %1368 = vmatpush.msrb.mxu0 %v1251_v58  ;;  %v1239_v20 = vld [vmem:[#allocation10 + $0x88] sm:$0xff]  ;;  %v1228_v56 = vld [vmem:[#allocation10 + $0x30] sm:$0xff]  ;;  %v583_v58 = vld [vmem:[#allocation7 + $0x38] sm:$0xff] }
  0x5d   : > { %675 = vmatmul.f32.gmra.mxu2 %v2400_v21  ;;  %1256 = vmatpush.msrb.mxu3 %v1248_v57  ;;  %v1231_v57 = vld [vmem:[#allocation10 + $0x48] sm:$0xff] }
  0x5e   : > { %1014 = vmatpush.msrb.mxu2 %v1005_v22  ;;  %723 = vmatpush.msrb.mxu1 %v603_v59  ;;  %v591_v22 = vld [vmem:[#allocation7 + $0x78] sm:$0xff] }
  0x5f   : > { %627 = vmatmul.f32.gmra.mxu0 %v2420_v38  ;;  %651 = vmatmul.f32.gmra.mxu1 %v2473_v52  ;;  %v2533_v59 = vld [vmem:[%s2381_s6 + $0x78] sm:$0xff] }
  0x60   : > { %1015 = vmatpush.msrb.mxu2 %v1004_v23  ;;  %699 = vmatmul.f32.gmra.mxu3 %v2478_v55  ;;  %v2511_v23 = vld [vmem:[%s2381_s6 + $0x68] sm:$0xff] }
  0x61   : > { %1257 = vmatpush.msrb.mxu3 %v1246_v61  ;;  %1369 = vmatpush.msrb.mxu0 %v1249_v62  ;;  %v1226_v61 = vld [vmem:[#allocation10 + $0x20] sm:$0xff]  ;;  %v1229_v62 = vld [vmem:[#allocation10 + $0x38] sm:$0xff] }
  0x62   : > { %1016 = vmatpush.msrb.mxu2 %v1003_v24  ;;  %724 = vmatpush.msrb.mxu1 %v601_v0  ;;  %v1234_v24 = vld [vmem:[#allocation10 + $0x60] sm:$0xff] }
  0x63   : > { %1258 = vmatpush.msrb.mxu3 %v1244_v1  ;;  %1370 = vmatpush.msrb.mxu0 %v1247_v2  ;;  %v2540_v1 = vld [vmem:[%s2381_s6 + $0xf8] sm:$0xff]  ;;  %v581_v2 = vld [vmem:[#allocation7 + $0x28] sm:$0xff] }
  0x64   : > { %1017 = vmatpush.msrb.mxu2 %v1002_v25  ;;  %725 = vmatpush.msrb.mxu1 %v599_v3  ;;  %v1237_v25 = vld [vmem:[#allocation10 + $0x78] sm:$0xff]  ;;  %v1224_v3 = vld [vmem:[#allocation10 + $0x10] sm:$0xff] }
  0x65   : > { %678 = vmatmul.f32.gmra.mxu2 %v2404_v26  ;;  %1259 = vmatpush.msrb.mxu3 %v1242_v5  ;;  %v1227_v5 = vld [vmem:[#allocation10 + $0x28] sm:$0xff] }
  0x66   : > { %1018 = vmatpush.msrb.mxu2 %v1001_v27  ;;  %1371 = vmatpush.msrb.mxu0 %v1245_v6  ;;  %v579_v6 = vld [vmem:[#allocation7 + $0x18] sm:$0xff] }
  0x67   : > { %630 = vmatmul.f32.gmra.mxu0 %v2428_v40  ;;  %654 = vmatmul.f32.gmra.mxu1 %v2482_v60 }
  0x68   : > { %1019 = vmatpush.msrb.mxu2 %v1000_v28  ;;  %702 = vmatmul.f32.gmra.mxu3 %v2487_v63  ;;  %v2518_v28 = vld [vmem:[%s2381_s6 + $0xe8] sm:$0xff] }
  0x69   : > { %726 = vmatpush.msrb.mxu1 %v597_v8  ;;  %1260 = vmatpush.msrb.mxu3 %v1240_v9  ;;  %v1222_v8 = vld [vmem:[#allocation10] sm:$0xff]  ;;  %v577_v9 = vld [vmem:[#allocation7 + $0x8] sm:$0xff] }
  0x6a   : > { %1020 = vmatpush.msrb.mxu2 %v999_v29  ;;  %1372 = vmatpush.msrb.mxu0 %v1243_v10  ;;  %v589_v29 = vld [vmem:[#allocation7 + $0x68] sm:$0xff]  ;;  %v1225_v10 = vld [vmem:[#allocation10 + $0x18] sm:$0xff] }
  0x6b   : > { %727 = vmatpush.msrb.mxu1 %v595_v11  ;;  %1261 = vmatpush.msrb.mxu3 %v1238_v13  ;;  %v1223_v11 = vld [vmem:[#allocation10 + $0x8] sm:$0xff] }
  0x6c   : > { %1021 = vmatpush.msrb.mxu2 %v998_v30  ;;  %1373 = vmatpush.msrb.mxu0 %v1241_v14  ;;  %v1232_v30 = vld [vmem:[#allocation10 + $0x50] sm:$0xff] }
  0x6d   : > { %681 = vmatmul.f32.gmra.mxu2 %v2408_v31  ;;  %728 = vmatpush.msrb.mxu1 %v593_v18 }
  0x6e   : > { %1022 = vmatpush.msrb.mxu2 %v997_v32  ;;  %1262 = vmatpush.msrb.mxu3 %v1236_v19  ;;  %v1235_v32 = vld [vmem:[#allocation10 + $0x68] sm:$0xff] }
  0x6f   : > { %633 = vmatmul.f32.gmra.mxu0 %v2436_v42  ;;  %657 = vmatmul.f32.gmra.mxu1 %v2491_v4 }
  0x70   : > { %1023 = vmatpush.msrb.mxu2 %v996_v33  ;;  %705 = vmatmul.f32.gmra.mxu3 %v2496_v7  ;;  %v587_v33 = vld [vmem:[#allocation7 + $0x58] sm:$0xff] }
  0x71   : > { %1374 = vmatpush.msrb.mxu0 %v1239_v20  ;;  %729 = vmatpush.msrb.mxu1 %v591_v22 }
  0x72   : > { %1024 = vmatpush.msrb.mxu2 %v995_v35  ;;  %1263 = vmatpush.msrb.mxu3 %v1234_v24  ;;  %v2522_v35 = vld [vmem:[%s2381_s6 + $0x70] sm:$0xff] }
  0x73   : > { %1375 = vmatpush.msrb.mxu0 %v1237_v25  ;;  %730 = vmatpush.msrb.mxu1 %v589_v29 }
  0x74   : > { %1025 = vmatpush.msrb.mxu2 %v994_v36  ;;  %1264 = vmatpush.msrb.mxu3 %v1232_v30  ;;  %v1230_v36 = vld [vmem:[#allocation10 + $0x40] sm:$0xff] }
  0x75   : > { %684 = vmatmul.f32.gmra.mxu2 %v2416_v37  ;;  %1376 = vmatpush.msrb.mxu0 %v1235_v32 }
  0x76   : > { %731 = vmatpush.msrb.mxu1 %v587_v33  ;;  %1265 = vmatpush.msrb.mxu3 %v1230_v36 }
  0x77   : > { %636 = vmatmul.f32.gmra.mxu0 %v2444_v44  ;;  %660 = vmatmul.f32.gmra.mxu1 %v2500_v12 }
  0x78   : > { %708 = vmatmul.f32.gmra.mxu3 %v2507_v17  ;;  %1377 = vmatpush.msrb.mxu0 %v1233_v50 }
  0x79   : > { %732 = vmatpush.msrb.mxu1 %v585_v54  ;;  %1266 = vmatpush.msrb.mxu3 %v1228_v56 }
  0x7a   : > { %1378 = vmatpush.msrb.mxu0 %v1231_v57 }
  0x7b   : > { %733 = vmatpush.msrb.mxu1 %v583_v58  ;;  %1267 = vmatpush.msrb.mxu3 %v1226_v61 }
  0x7c   : > { %1379 = vmatpush.msrb.mxu0 %v1229_v62 }
  0x7d   : > { %687 = vmatmul.f32.gmra.mxu2 %v2424_v39  ;;  %734 = vmatpush.msrb.mxu1 %v581_v2 }
  0x7e   : > { %1268 = vmatpush.msrb.mxu3 %v1224_v3  ;;  %1380 = vmatpush.msrb.mxu0 %v1227_v5 }
  0x7f   : > { %639 = vmatmul.f32.gmra.mxu0 %v2449_v45  ;;  %663 = vmatmul.f32.gmra.mxu1 %v2511_v23 }
  0x80   : > { %711 = vmatmul.f32.gmra.mxu3 %v2518_v28  ;;  %735 = vmatpush.msrb.mxu1 %v579_v6 }
  0x81   : > { %1269 = vmatpush.msrb.mxu3 %v1222_v8  ;;  %1381 = vmatpush.msrb.mxu0 %v1225_v10 }
  0x82   : > { %736 = vmatpush.msrb.mxu1 %v577_v9 }
  0x83   : > { %1382 = vmatpush.msrb.mxu0 %v1223_v11 }
  0x85   : > { %690 = vmatmul.f32.gmra.mxu2 %v2432_v41 }
  0x87   : > { %642 = vmatmul.f32.gmra.mxu0 %v2454_v46  ;;  %666 = vmatmul.f32.gmra.mxu1 %v2522_v35 }
  0x88   : > { %714 = vmatmul.f32.gmra.mxu3 %v2529_v53 }
  0x8d   : > { %693 = vmatmul.f32.gmra.mxu2 %v2440_v43 }
  0x8f   : > { %645 = vmatmul.f32.gmra.mxu0 %v2459_v47  ;;  %669 = vmatmul.f32.gmra.mxu1 %v2533_v59 }
  0x90   : > { %717 = vmatmul.f32.gmra.mxu3 %v2540_v1 }
  0x95   : > { %1026 = vmatmul.f32.vlgmr.msrb.gmra.mxu2 %v2412_v34 }
  0x97   : > { %737 = vmatmul.f32.vlgmr.msrb.gmra.mxu1 %v2412_v34 }
  0x9d   : > { %1029 = vmatmul.f32.gmra.mxu2 %v2420_v38 }
  0x9f   : > { %740 = vmatmul.f32.gmra.mxu1 %v2420_v38 }
  0xa5   : > { %1032 = vmatmul.f32.gmra.mxu2 %v2428_v40 }
  0xa7   : > { %743 = vmatmul.f32.gmra.mxu1 %v2428_v40 }
  0xad   : > { %1035 = vmatmul.f32.gmra.mxu2 %v2436_v42 }
  0xaf   : > { %746 = vmatmul.f32.gmra.mxu1 %v2436_v42 }
  0xb5   : > { %1038 = vmatmul.f32.gmra.mxu2 %v2444_v44 }
  0xb7   : > { %749 = vmatmul.f32.gmra.mxu1 %v2444_v44 }
  0xbd   : > { %1041 = vmatmul.f32.gmra.mxu2 %v2449_v45 }
  0xbf   : > { %752 = vmatmul.f32.gmra.mxu1 %v2449_v45 }
  0xc5   : > { %1044 = vmatmul.f32.gmra.mxu2 %v2454_v46 }
  0xc7   : > { %755 = vmatmul.f32.gmra.mxu1 %v2454_v46 }
  0xcd   : > { %1047 = vmatmul.f32.gmra.mxu2 %v2459_v47 }
  0xcf   : > { %758 = vmatmul.f32.gmra.mxu1 %v2459_v47 }
  0xd4   : > { %v2567_v44 = vpop.f32.mrf.mxu1  ;;  %v2578_v22 = vpop.f32.mrf.mxu0 }
  0xd5   : > { %1050 = vmatmul.f32.gmra.mxu2 %v2464_v48 }
  0xd7   : > { %761 = vmatmul.f32.gmra.mxu1 %v2464_v48 }
  0xd8   : > { %v2504_v15 = vpop.f32.mrf.mxu2 }
  0xdb   : > { %v2583_v25 = vpop.f32.mrf.mxu3 }
  0xdc   : > { %v2571_v46 = vpop.f32.mrf.mxu1  ;;  %v2587_v29 = vpop.f32.mrf.mxu0 }
  0xdd   : > { %1053 = vmatmul.f32.gmra.mxu2 %v2473_v52 }
  0xdf   : > { %764 = vmatmul.f32.gmra.mxu1 %v2473_v52 }
  0xe0   : > { %v2515_v27 = vpop.f32.mrf.mxu2 }
  0xe4   : > { %v2575_v47 = vpop.f32.mrf.mxu1  ;;  %v2597_v36 = vpop.f32.mrf.mxu0 }
  0xe5   : > { %1056 = vmatmul.f32.gmra.mxu2 %v2482_v60 }
  0xe7   : > { %767 = vmatmul.f32.gmra.mxu1 %v2482_v60  ;;  %v2592_v60 = vpop.f32.mrf.mxu3 }
  0xe8   : > { %v2526_v51 = vpop.f32.mrf.mxu2 }
  0xec   : > { %v2581_v24 = vpop.f32.mrf.mxu1  ;;  %v2605_v56 = vpop.f32.mrf.mxu0 }
  0xed   : > { %1059 = vmatmul.f32.gmra.mxu2 %v2491_v4 }
  0xef   : > { %770 = vmatmul.f32.gmra.mxu1 %v2491_v4  ;;  %v2601_v50 = vpop.f32.mrf.mxu3 }
  0xf0   : > { %v2537_v0 = vpop.f32.mrf.mxu2 }
  0xf4   : > { %v2589_v30 = vpop.f32.mrf.mxu1 }
  0xf5   : > { %1062 = vmatmul.f32.gmra.mxu2 %v2500_v12 }
  0xf7   : > { %773 = vmatmul.f32.gmra.mxu1 %v2500_v12  ;;  %v2609_v57 = vpop.f32.mrf.mxu3 }
  0xf8   : > { %v2545_v13 = vpop.f32.mrf.mxu2 }
  0xfc   : > { %v2595_v33 = vpop.f32.mrf.mxu1 }
  0xfd   : > { %1065 = vmatmul.f32.gmra.mxu2 %v2511_v23 }
  0xff   : > { %776 = vmatmul.f32.gmra.mxu1 %v2511_v23  ;;  %v2614_v23 = vpop.f32.mrf.mxu0  ;;  %v2617_v62 = vpop.f32.mrf.mxu3 }
 0x100   : > { %v2549_v14 = vpop.f32.mrf.mxu2 }
 0x104   : > { %v2603_v54 = vpop.f32.mrf.mxu1 }
 0x105   : > { %1068 = vmatmul.f32.gmra.mxu2 %v2522_v35 }
 0x107   : > { %779 = vmatmul.f32.gmra.mxu1 %v2522_v35  ;;  %v2621_v3 = vpop.f32.mrf.mxu0  ;;  %v2624_v6 = vpop.f32.mrf.mxu3 }
 0x108   : > { %v2553_v18 = vpop.f32.mrf.mxu2 }
 0x10c   : > { %v2611_v58 = vpop.f32.mrf.mxu1 }
 0x10d   : > { %1071 = vmatmul.f32.gmra.mxu2 %v2533_v59 }
 0x10f   : > { %782 = vmatmul.f32.gmra.mxu1 %v2533_v59  ;;  %v2627_v8 = vpop.f32.mrf.mxu0  ;;  %v2631_v10 = vpop.f32.mrf.mxu3 }
 0x110   : > { %v2557_v34 = vpop.f32.mrf.mxu2 }
 0x114   : > { %v738_v2 = vpop.f32.mrf.mxu1 }
 0x115   : > { %1074 = vmatmul.f32.gmra.mxu2 %v2396_v16 }
 0x117   : > { %785 = vmatmul.f32.gmra.mxu1 %v2396_v16  ;;  %v2633_v11 = vpop.f32.mrf.mxu0 }
 0x118   : > { %v1027_v19 = vpop.f32.mrf.mxu2 }
 0x119   : > { %1270 = vmatmul.f32.vlgmr.msrb.gmra.mxu3 %v1027_v19  ;;  %1383 = vmatmul.f32.vlgmr.msrb.gmra.mxu0 %v1027_v19 }
 0x11c   : > { %v741_v5 = vpop.f32.mrf.mxu1 }
 0x11d   : > { %1077 = vmatmul.f32.gmra.mxu2 %v2400_v21 }
 0x11f   : > { %788 = vmatmul.f32.gmra.mxu1 %v2400_v21  ;;  %v378_v21 = vld [vmem:[%s2864_s4] sm:$0x3] }
 0x120   : > { %v1030_v38 = vpop.f32.mrf.mxu2 }
 0x121   : > { %1273 = vmatmul.f32.gmra.mxu3 %v1030_v38  ;;  %1386 = vmatmul.f32.gmra.mxu0 %v1030_v38  ;;  %v2639_v38 = vperm.slane %v378_v21, 1 }
 0x124   : > { %v744_v9 = vpop.f32.mrf.mxu1 }
 0x125   : > { %1080 = vmatmul.f32.gmra.mxu2 %v2404_v26 }
 0x127   : > { %791 = vmatmul.f32.gmra.mxu1 %v2404_v26 }
 0x128   : > { %v1033_v40 = vpop.f32.mrf.mxu2 }
 0x129   : > { %1276 = vmatmul.f32.gmra.mxu3 %v1033_v40  ;;  %1389 = vmatmul.f32.gmra.mxu0 %v1033_v40  ;;  %v2642_v40 = vpop.f32.mrf.mxu3 }
 0x12c   : > { %v747_v19 = vpop.f32.mrf.mxu1 }
 0x12d   : > { %1083 = vmatmul.f32.gmra.mxu2 %v2408_v31 }
 0x12f   : > { %794 = vmatmul.f32.gmra.mxu1 %v2408_v31 }
 0x130   : > { %v1036_v42 = vpop.f32.mrf.mxu2 }
 0x131   : > { %1279 = vmatmul.f32.gmra.mxu3 %v1036_v42  ;;  %1392 = vmatmul.f32.gmra.mxu0 %v1036_v42  ;;  %v835_v42 = vadd.f32 %v738_v2, %v2639_v38 }
 0x135   : > { %1086 = vmatmul.f32.gmra.mxu2 %v2416_v37 }
 0x137   : > { %797 = vmatmul.f32.gmra.mxu1 %v2416_v37 }
 0x138   : > { %v1039_v45 = vpop.f32.mrf.mxu2 }
 0x139   : > { %1282 = vmatmul.f32.gmra.mxu3 %v1039_v45  ;;  %1395 = vmatmul.f32.gmra.mxu0 %v1039_v45  ;;  %v750_v45 = vpop.f32.mrf.mxu1 }
 0x13d   : > { %1089 = vmatmul.f32.gmra.mxu2 %v2424_v39 }
 0x13f   : > { %800 = vmatmul.f32.gmra.mxu1 %v2424_v39 }
 0x140   : > { %v1042_v20 = vpop.f32.mrf.mxu2 }
 0x141   : > { %1285 = vmatmul.f32.gmra.mxu3 %v1042_v20  ;;  %1398 = vmatmul.f32.gmra.mxu0 %v1042_v20 }
 0x145   : > { %1092 = vmatmul.f32.gmra.mxu2 %v2432_v41 }
 0x147   : > { %803 = vmatmul.f32.gmra.mxu1 %v2432_v41 }
 0x148   : > { %v1045_v48 = vpop.f32.mrf.mxu2 }
 0x149   : > { %1288 = vmatmul.f32.gmra.mxu3 %v1045_v48  ;;  %1401 = vmatmul.f32.gmra.mxu0 %v1045_v48 }
 0x14d   : > { %1095 = vmatmul.f32.gmra.mxu2 %v2440_v43 }
 0x14f   : > { %806 = vmatmul.f32.gmra.mxu1 %v2440_v43 }
 0x150   : > { %v1048_v52 = vpop.f32.mrf.mxu2 }
 0x151   : > { %1291 = vmatmul.f32.gmra.mxu3 %v1048_v52  ;;  %1404 = vmatmul.f32.gmra.mxu0 %v1048_v52 }
 0x155   : > { %1098 = vmatmul.f32.gmra.mxu2 %v2469_v49 }
 0x157   : > { %809 = vmatmul.f32.gmra.mxu1 %v2469_v49 }
 0x158   : > { %v1051_v32 = vpop.f32.mrf.mxu2 }
 0x159   : > { %1294 = vmatmul.f32.gmra.mxu3 %v1051_v32  ;;  %1407 = vmatmul.f32.gmra.mxu0 %v1051_v32  ;;  %v2647_v32 = vperm.slane %v378_v21, 0 }
 0x15b   : > { %v834_v31 = vadd.f32 %v2578_v22, %v2647_v32  ;;  %v839_v22 = vadd.f32 %v744_v9, %v2639_v38 }
 0x15d   : > { %1101 = vmatmul.f32.gmra.mxu2 %v2478_v55 }
 0x15f   : > { %812 = vmatmul.f32.gmra.mxu1 %v2478_v55 }
 0x160   : > { %v1054_v4 = vpop.f32.mrf.mxu2 }
 0x161   : > { %1297 = vmatmul.f32.gmra.mxu3 %v1054_v4  ;;  %1410 = vmatmul.f32.gmra.mxu0 %v1054_v4  ;;  %v837_v4 = vadd.f32 %v741_v5, %v2639_v38 }
 0x165   : > { %1104 = vmatmul.f32.gmra.mxu2 %v2487_v63 }
 0x167   : > { %815 = vmatmul.f32.gmra.mxu1 %v2487_v63 }
 0x168   : > { %v1057_v12 = vpop.f32.mrf.mxu2 }
 0x169   : > { %1300 = vmatmul.f32.gmra.mxu3 %v1057_v12  ;;  %1413 = vmatmul.f32.gmra.mxu0 %v1057_v12 }
 0x16d   : > { %1107 = vmatmul.f32.gmra.mxu2 %v2496_v7 }
 0x16f   : > { %818 = vmatmul.f32.gmra.mxu1 %v2496_v7 }
 0x170   : > { %v1060_v61 = vpop.f32.mrf.mxu2 }
 0x171   : > { %1303 = vmatmul.f32.gmra.mxu3 %v1060_v61  ;;  %1416 = vmatmul.f32.gmra.mxu0 %v1060_v61  ;;  %v753_v61 = vpop.f32.mrf.mxu1 }
 0x175   : > { %1110 = vmatmul.f32.gmra.mxu2 %v2507_v17 }
 0x177   : > { %821 = vmatmul.f32.gmra.mxu1 %v2507_v17 }
 0x178   : > { %v1063_v35 = vpop.f32.mrf.mxu2 }
 0x179   : > { %1306 = vmatmul.f32.gmra.mxu3 %v1063_v35  ;;  %1419 = vmatmul.f32.gmra.mxu0 %v1063_v35  ;;  %v756_v21 = vpop.f32.mrf.mxu1 }
 0x17d   : > { %1113 = vmatmul.f32.gmra.mxu2 %v2518_v28 }
 0x17f   : > { %824 = vmatmul.f32.gmra.mxu1 %v2518_v28 }
 0x180   : > { %v1066_v59 = vpop.f32.mrf.mxu2 }
 0x181   : > { %1309 = vmatmul.f32.gmra.mxu3 %v1066_v59  ;;  %1422 = vmatmul.f32.gmra.mxu0 %v1066_v59 }
 0x185   : > { %1116 = vmatmul.f32.gmra.mxu2 %v2529_v53 }
 0x187   : > { %827 = vmatmul.f32.gmra.mxu1 %v2529_v53 }
 0x188   : > { %v1069_v16 = vpop.f32.mrf.mxu2 }
 0x189   : > { %1312 = vmatmul.f32.gmra.mxu3 %v1069_v16  ;;  %1425 = vmatmul.f32.gmra.mxu0 %v1069_v16  ;;  %v836_v16 = vadd.f32 %v2587_v29, %v2647_v32  ;;  %v841_v29 = vadd.f32 %v747_v19, %v2639_v38 }
 0x18d   : > { %1119 = vmatmul.f32.gmra.mxu2 %v2540_v1 }
 0x190   : > { %v1072_v26 = vpop.f32.mrf.mxu2 }
 0x191   : > { %1315 = vmatmul.f32.gmra.mxu3 %v1072_v26  ;;  %1428 = vmatmul.f32.gmra.mxu0 %v1072_v26 }
 0x196   : > { %v1384_v20 = vpop.f32.mrf.mxu0 }
 0x197   : > { %v1545_v48 = vadd.f32 %v1384_v20, %v835_v42 }
 0x198   : > { %v1075_v52 = vpop.f32.mrf.mxu2 }
 0x199   : > { %1609 = vst [vmem:[%s2649_s26 + $0x8] sm:$0xff] %v1545_v48  ;;  %1318 = vmatmul.f32.gmra.mxu3 %v1075_v52  ;;  %1431 = vmatmul.f32.gmra.mxu0 %v1075_v52  ;;  %v838_v48 = vadd.f32 %v2597_v36, %v2647_v32  ;;  %v759_v52 = vpop.f32.mrf.mxu1  ;;  %v843_v36 = vadd.f32 %v750_v45, %v2639_v38 }
 0x19a   : > { %830 = vmatmul.f32.gmra.mxu1 %v2540_v1  ;;  %v858_v1 = vadd.f32 %v2589_v30, %v2647_v32 }
 0x19c   : > { %v1271_v12 = vpop.f32.mrf.mxu3 }
 0x19d   : > { %v1544_v37 = vadd.f32 %v1271_v12, %v834_v31 }
 0x19e   : > { %v1387_v2 = vpop.f32.mrf.mxu0 }
 0x19f   : > { %1608 = vst [vmem:[%s2649_s26] sm:$0xff] %v1544_v37  ;;  %v1547_v35 = vadd.f32 %v1387_v2, %v837_v4  ;;  %v840_v37 = vadd.f32 %v2605_v56, %v2647_v32  ;;  %v845_v56 = vadd.f32 %v753_v61, %v2639_v38 }
 0x1a0   : > { %v1078_v59 = vpop.f32.mrf.mxu2 }
 0x1a1   : > { %1611 = vst [vmem:[%s2649_s26 + $0x18] sm:$0xff] %v1547_v35  ;;  %1321 = vmatmul.f32.gmra.mxu3 %v1078_v59  ;;  %1434 = vmatmul.f32.gmra.mxu0 %v1078_v59  ;;  %v762_v2 = vpop.f32.mrf.mxu1 }
 0x1a4   : > { %v1274_v5 = vpop.f32.mrf.mxu3 }
 0x1a5   : > { %v1546_v26 = vadd.f32 %v1274_v5, %v836_v16 }
 0x1a6   : > { %v1390_v42 = vpop.f32.mrf.mxu0 }
 0x1a7   : > { %1610 = vst [vmem:[%s2649_s26 + $0x10] sm:$0xff] %v1546_v26  ;;  %v1549_v20 = vadd.f32 %v1390_v42, %v839_v22  ;;  %v842_v22 = vadd.f32 %v2614_v23, %v2647_v32  ;;  %v847_v23 = vadd.f32 %v756_v21, %v2639_v38 }
 0x1a8   : > { %v1081_v39 = vpop.f32.mrf.mxu2 }
 0x1a9   : > { %1613 = vst [vmem:[%s2649_s26 + $0x28] sm:$0xff] %v1549_v20  ;;  %1324 = vmatmul.f32.gmra.mxu3 %v1081_v39  ;;  %1437 = vmatmul.f32.gmra.mxu0 %v1081_v39  ;;  %v765_v5 = vpop.f32.mrf.mxu1  ;;  %v844_v39 = vadd.f32 %v2621_v3, %v2647_v32  ;;  %v849_v3 = vadd.f32 %v759_v52, %v2639_v38 }
 0x1ac   : > { %v1277_v9 = vpop.f32.mrf.mxu3 }
 0x1ad   : > { %v1548_v31 = vadd.f32 %v1277_v9, %v838_v48 }
 0x1ae   : > { %v1393_v4 = vpop.f32.mrf.mxu0 }
 0x1af   : > { %1612 = vst [vmem:[%s2649_s26 + $0x20] sm:$0xff] %v1548_v31  ;;  %v1551_v12 = vadd.f32 %v1393_v4, %v841_v29  ;;  %v846_v4 = vadd.f32 %v2627_v8, %v2647_v32  ;;  %v851_v8 = vadd.f32 %v762_v2, %v2639_v38 }
 0x1b0   : > { %v1084_v41 = vpop.f32.mrf.mxu2 }
 0x1b1   : > { %1615 = vst [vmem:[%s2649_s26 + $0x38] sm:$0xff] %v1551_v12  ;;  %1327 = vmatmul.f32.gmra.mxu3 %v1084_v41  ;;  %1440 = vmatmul.f32.gmra.mxu0 %v1084_v41  ;;  %v768_v48 = vpop.f32.mrf.mxu1 }
 0x1b4   : > { %v1280_v19 = vpop.f32.mrf.mxu3 }
 0x1b5   : > { %v1550_v35 = vadd.f32 %v1280_v19, %v840_v37  ;;  %v848_v19 = vadd.f32 %v2633_v11, %v2647_v32  ;;  %v853_v11 = vadd.f32 %v765_v5, %v2639_v38 }
 0x1b6   : > { %v1396_v59 = vpop.f32.mrf.mxu0 }
 0x1b7   : > { %1614 = vst [vmem:[%s2649_s26 + $0x30] sm:$0xff] %v1550_v35  ;;  %v1553_v16 = vadd.f32 %v1396_v59, %v843_v36 }
 0x1b8   : > { %v1087_v43 = vpop.f32.mrf.mxu2 }
 0x1b9   : > { %1617 = vst [vmem:[%s2649_s26 + $0x48] sm:$0xff] %v1553_v16  ;;  %1330 = vmatmul.f32.gmra.mxu3 %v1087_v43  ;;  %1443 = vmatmul.f32.gmra.mxu0 %v1087_v43  ;;  %v771_v12 = vpop.f32.mrf.mxu1 }
 0x1bc   : > { %v1283_v45 = vpop.f32.mrf.mxu3 }
 0x1bd   : > { %v1552_v26 = vadd.f32 %v1283_v45, %v842_v22  ;;  %v850_v22 = vadd.f32 %v2567_v44, %v2647_v32  ;;  %v855_v44 = vadd.f32 %v768_v48, %v2639_v38 }
 0x1be   : > { %v1399_v42 = vpop.f32.mrf.mxu0 }
 0x1bf   : > { %1616 = vst [vmem:[%s2649_s26 + $0x40] sm:$0xff] %v1552_v26  ;;  %v1555_v20 = vadd.f32 %v1399_v42, %v845_v56 }
 0x1c0   : > { %v1090_v49 = vpop.f32.mrf.mxu2 }
 0x1c1   : > { %1619 = vst [vmem:[%s2649_s26 + $0x58] sm:$0xff] %v1555_v20  ;;  %1333 = vmatmul.f32.gmra.mxu3 %v1090_v49  ;;  %1446 = vmatmul.f32.gmra.mxu0 %v1090_v49  ;;  %v774_v35 = vpop.f32.mrf.mxu1  ;;  %v852_v20 = vadd.f32 %v2571_v46, %v2647_v32  ;;  %v857_v46 = vadd.f32 %v771_v12, %v2639_v38 }
 0x1c4   : > { %v1286_v61 = vpop.f32.mrf.mxu3 }
 0x1c5   : > { %v1554_v29 = vadd.f32 %v1286_v61, %v844_v39 }
 0x1c6   : > { %v1402_v9 = vpop.f32.mrf.mxu0 }
 0x1c7   : > { %1618 = vst [vmem:[%s2649_s26 + $0x50] sm:$0xff] %v1554_v29  ;;  %v1557_v31 = vadd.f32 %v1402_v9, %v847_v23  ;;  %v854_v29 = vadd.f32 %v2575_v47, %v2647_v32  ;;  %v859_v47 = vadd.f32 %v774_v35, %v2639_v38 }
 0x1c8   : > { %v1093_v55 = vpop.f32.mrf.mxu2 }
 0x1c9   : > { %1621 = vst [vmem:[%s2649_s26 + $0x68] sm:$0xff] %v1557_v31  ;;  %1336 = vmatmul.f32.gmra.mxu3 %v1093_v55  ;;  %1449 = vmatmul.f32.gmra.mxu0 %v1093_v55  ;;  %v777_v56 = vpop.f32.mrf.mxu1 }
 0x1cc   : > { %v1289_v21 = vpop.f32.mrf.mxu3 }
 0x1cd   : > { %v1556_v41 = vadd.f32 %v1289_v21, %v846_v4 }
 0x1ce   : > { %v1405_v37 = vpop.f32.mrf.mxu0 }
 0x1cf   : > { %1620 = vst [vmem:[%s2649_s26 + $0x60] sm:$0xff] %v1556_v41  ;;  %v1559_v36 = vadd.f32 %v1405_v37, %v849_v3  ;;  %v856_v3 = vadd.f32 %v2581_v24, %v2647_v32 }
 0x1d0   : > { %v1096_v63 = vpop.f32.mrf.mxu2 }
 0x1d1   : > { %1623 = vst [vmem:[%s2649_s26 + $0x78] sm:$0xff] %v1559_v36  ;;  %1339 = vmatmul.f32.gmra.mxu3 %v1096_v63  ;;  %1452 = vmatmul.f32.gmra.mxu0 %v1096_v63  ;;  %v780_v49 = vpop.f32.mrf.mxu1 }
 0x1d4   : > { %v1292_v52 = vpop.f32.mrf.mxu3 }
 0x1d5   : > { %v1558_v59 = vadd.f32 %v1292_v52, %v848_v19  ;;  %v861_v19 = vadd.f32 %v777_v56, %v2639_v38 }
 0x1d6   : > { %v1408_v16 = vpop.f32.mrf.mxu0 }
 0x1d7   : > { %1622 = vst [vmem:[%s2649_s26 + $0x70] sm:$0xff] %v1558_v59  ;;  %v1561_v43 = vadd.f32 %v1408_v16, %v851_v8 }
 0x1d8   : > { %v1099_v7 = vpop.f32.mrf.mxu2 }
 0x1d9   : > { %1625 = vst [vmem:[%s2649_s26 + $0x88] sm:$0xff] %v1561_v43  ;;  %1342 = vmatmul.f32.gmra.mxu3 %v1099_v7  ;;  %1455 = vmatmul.f32.gmra.mxu0 %v1099_v7  ;;  %v783_v9 = vpop.f32.mrf.mxu1  ;;  %v860_v43 = vadd.f32 %v2595_v33, %v2647_v32  ;;  %v863_v7 = vadd.f32 %v780_v49, %v2639_v38 }
 0x1dc   : > { %v1295_v2 = vpop.f32.mrf.mxu3 }
 0x1dd   : > { %v1560_v45 = vadd.f32 %v1295_v2, %v850_v22 }
 0x1de   : > { %v1411_v26 = vpop.f32.mrf.mxu0 }
 0x1df   : > { %1624 = vst [vmem:[%s2649_s26 + $0x80] sm:$0xff] %v1560_v45  ;;  %v1563_v42 = vadd.f32 %v1411_v26, %v853_v11  ;;  %v862_v26 = vadd.f32 %v2603_v54, %v2647_v32 }
 0x1e0   : > { %v1102_v17 = vpop.f32.mrf.mxu2 }
 0x1e1   : > { %1627 = vst [vmem:[%s2649_s26 + $0x98] sm:$0xff] %v1563_v42  ;;  %1345 = vmatmul.f32.gmra.mxu3 %v1102_v17  ;;  %1458 = vmatmul.f32.gmra.mxu0 %v1102_v17  ;;  %v786_v12 = vpop.f32.mrf.mxu1  ;;  %v865_v42 = vadd.f32 %v783_v9, %v2639_v38 }
 0x1e2   : > { %v867_v54 = vadd.f32 %v786_v12, %v2639_v38 }
 0x1e4   : > { %v1298_v5 = vpop.f32.mrf.mxu3 }
 0x1e5   : > { %v1562_v39 = vadd.f32 %v1298_v5, %v852_v20 }
 0x1e6   : > { %v1414_v23 = vpop.f32.mrf.mxu0 }
 0x1e7   : > { %1626 = vst [vmem:[%s2649_s26 + $0x90] sm:$0xff] %v1562_v39  ;;  %v1565_v61 = vadd.f32 %v1414_v23, %v855_v44  ;;  %v864_v39 = vadd.f32 %v2611_v58, %v2647_v32 }
 0x1e8   : > { %v1105_v28 = vpop.f32.mrf.mxu2 }
 0x1e9   : > { %1629 = vst [vmem:[%s2649_s26 + $0xa8] sm:$0xff] %v1565_v61  ;;  %1348 = vmatmul.f32.gmra.mxu3 %v1105_v28  ;;  %1461 = vmatmul.f32.gmra.mxu0 %v1105_v28  ;;  %v789_v8 = vpop.f32.mrf.mxu1 }
 0x1ea   : > { %v869_v9 = vadd.f32 %v789_v8, %v2639_v38  ;;  %v872_v8 = vadd.f32 %v2537_v0, %v2647_v32 }
 0x1ec   : > { %v1301_v48 = vpop.f32.mrf.mxu3 }
 0x1ed   : > { %v1564_v31 = vadd.f32 %v1301_v48, %v854_v29  ;;  %v866_v48 = vadd.f32 %v2504_v15, %v2647_v32 }
 0x1ee   : > { %v1417_v55 = vpop.f32.mrf.mxu0 }
 0x1ef   : > { %1628 = vst [vmem:[%s2649_s26 + $0xa0] sm:$0xff] %v1564_v31  ;;  %v1567_v4 = vadd.f32 %v1417_v55, %v857_v46 }
 0x1f0   : > { %v1108_v53 = vpop.f32.mrf.mxu2 }
 0x1f1   : > { %1631 = vst [vmem:[%s2649_s26 + $0xb8] sm:$0xff] %v1567_v4  ;;  %1351 = vmatmul.f32.gmra.mxu3 %v1108_v53  ;;  %1464 = vmatmul.f32.gmra.mxu0 %v1108_v53  ;;  %v792_v2 = vpop.f32.mrf.mxu1  ;;  %v868_v53 = vadd.f32 %v2515_v27, %v2647_v32 }
 0x1f4   : > { %v1304_v21 = vpop.f32.mrf.mxu3 }
 0x1f5   : > { %v1566_v41 = vadd.f32 %v1304_v21, %v856_v3  ;;  %v871_v3 = vadd.f32 %v792_v2, %v2639_v38 }
 0x1f6   : > { %v1420_v37 = vpop.f32.mrf.mxu0 }
 0x1f7   : > { %1630 = vst [vmem:[%s2649_s26 + $0xb0] sm:$0xff] %v1566_v41  ;;  %v1569_v36 = vadd.f32 %v1420_v37, %v859_v47  ;;  %v870_v37 = vadd.f32 %v2526_v51, %v2647_v32 }
 0x1f8   : > { %v1111_v63 = vpop.f32.mrf.mxu2 }
 0x1f9   : > { %1633 = vst [vmem:[%s2649_s26 + $0xc8] sm:$0xff] %v1569_v36  ;;  %1354 = vmatmul.f32.gmra.mxu3 %v1111_v63  ;;  %1467 = vmatmul.f32.gmra.mxu0 %v1111_v63  ;;  %v795_v49 = vpop.f32.mrf.mxu1 }
 0x1fa   : > { %v873_v36 = vadd.f32 %v795_v49, %v2639_v38 }
 0x1fc   : > { %v1307_v24 = vpop.f32.mrf.mxu3 }
 0x1fd   : > { %v1568_v52 = vadd.f32 %v1307_v24, %v858_v1 }
 0x1fe   : > { %v1423_v35 = vpop.f32.mrf.mxu0 }
 0x1ff   : > { %1632 = vst [vmem:[%s2649_s26 + $0xc0] sm:$0xff] %v1568_v52  ;;  %v1571_v59 = vadd.f32 %v1423_v35, %v861_v19 }
 0x200   : > { %v1114_v16 = vpop.f32.mrf.mxu2 }
 0x201   : > { %1635 = vst [vmem:[%s2649_s26 + $0xd8] sm:$0xff] %v1571_v59  ;;  %1357 = vmatmul.f32.gmra.mxu3 %v1114_v16  ;;  %1470 = vmatmul.f32.gmra.mxu0 %v1114_v16  ;;  %v798_v46 = vpop.f32.mrf.mxu1 }
 0x202   : > { %v875_v52 = vadd.f32 %v798_v46, %v2639_v38 }
 0x204   : > { %v1310_v30 = vpop.f32.mrf.mxu3 }
 0x205   : > { %v1570_v22 = vadd.f32 %v1310_v30, %v860_v43 }
 0x206   : > { %v1426_v11 = vpop.f32.mrf.mxu0 }
 0x207   : > { %1634 = vst [vmem:[%s2649_s26 + $0xd0] sm:$0xff] %v1570_v22  ;;  %v1573_v56 = vadd.f32 %v1426_v11, %v863_v7  ;;  %v874_v7 = vadd.f32 %v2545_v13, %v2647_v32 }
 0x208   : > { %v1117_v45 = vpop.f32.mrf.mxu2 }
 0x209   : > { %1637 = vst [vmem:[%s2649_s26 + $0xe8] sm:$0xff] %v1573_v56  ;;  %1360 = vmatmul.f32.gmra.mxu3 %v1117_v45  ;;  %1473 = vmatmul.f32.gmra.mxu0 %v1117_v45  ;;  %v801_v21 = vpop.f32.mrf.mxu1  ;;  %v876_v45 = vadd.f32 %v2549_v14, %v2647_v32 }
 0x20a   : > { %v877_v30 = vadd.f32 %v801_v21, %v2639_v38 }
 0x20c   : > { %v1313_v33 = vpop.f32.mrf.mxu3 }
 0x20d   : > { %v1572_v17 = vadd.f32 %v1313_v33, %v862_v26 }
 0x20e   : > { %v1429_v20 = vpop.f32.mrf.mxu0 }
 0x20f   : > { %1636 = vst [vmem:[%s2649_s26 + $0xe0] sm:$0xff] %v1572_v17  ;;  %v1575_v44 = vadd.f32 %v1429_v20, %v865_v42  ;;  %v878_v20 = vadd.f32 %v2553_v18, %v2647_v32 }
 0x210   : > { %v1120_v5 = vpop.f32.mrf.mxu2 }
 0x211   : > { %1639 = vst [vmem:[%s2649_s26 + $0xf8] sm:$0xff] %v1575_v44  ;;  %1363 = vmatmul.f32.gmra.mxu3 %v1120_v5  ;;  %1476 = vmatmul.f32.gmra.mxu0 %v1120_v5  ;;  %v804_v19 = vpop.f32.mrf.mxu1 }
 0x212   : > { %v879_v26 = vadd.f32 %v804_v19, %v2639_v38  ;;  %v888_v19 = vadd.f32 %v2609_v57, %v2647_v32 }
 0x214   : > { %v1316_v23 = vpop.f32.mrf.mxu3 }
 0x215   : > { %v1574_v61 = vadd.f32 %v1316_v23, %v864_v39  ;;  %v880_v23 = vadd.f32 %v2557_v34, %v2647_v32 }
 0x216   : > { %v1432_v28 = vpop.f32.mrf.mxu0 }
 0x217   : > { %1638 = vst [vmem:[%s2649_s26 + $0xf0] sm:$0xff] %v1574_v61  ;;  %v1577_v29 = vadd.f32 %v1432_v28, %v867_v54 }
 0x219   : > { %1641 = vst [vmem:[%s2649_s26 + $0x108] sm:$0xff] %v1577_v29  ;;  %v807_v43 = vpop.f32.mrf.mxu1 }
 0x21a   : > { %v881_v44 = vadd.f32 %v807_v43, %v2639_v38 }
 0x21c   : > { %v1319_v31 = vpop.f32.mrf.mxu3 }
 0x21d   : > { %v1576_v55 = vadd.f32 %v1319_v31, %v866_v48 }
 0x21e   : > { %v1435_v58 = vpop.f32.mrf.mxu0 }
 0x21f   : > { %1640 = vst [vmem:[%s2649_s26 + $0x100] sm:$0xff] %v1576_v55  ;;  %v1579_v4 = vadd.f32 %v1435_v58, %v869_v9  ;;  %v882_v9 = vadd.f32 %v2583_v25, %v2647_v32 }
 0x221   : > { %1643 = vst [vmem:[%s2649_s26 + $0x118] sm:$0xff] %v1579_v4  ;;  %v810_v56 = vpop.f32.mrf.mxu1 }
 0x222   : > { %v883_v61 = vadd.f32 %v810_v56, %v2639_v38 }
 0x224   : > { %v1322_v47 = vpop.f32.mrf.mxu3 }
 0x225   : > { %v1578_v12 = vadd.f32 %v1322_v47, %v868_v53 }
 0x226   : > { %v1438_v15 = vpop.f32.mrf.mxu0 }
 0x227   : > { %1642 = vst [vmem:[%s2649_s26 + $0x110] sm:$0xff] %v1578_v12  ;;  %v1581_v41 = vadd.f32 %v1438_v15, %v871_v3  ;;  %v884_v3 = vadd.f32 %v2592_v60, %v2647_v32 }
 0x229   : > { %1645 = vst [vmem:[%s2649_s26 + $0x128] sm:$0xff] %v1581_v41  ;;  %v813_v49 = vpop.f32.mrf.mxu1 }
 0x22a   : > { %v885_v31 = vadd.f32 %v813_v49, %v2639_v38 }
 0x22c   : > { %v1325_v63 = vpop.f32.mrf.mxu3 }
 0x22d   : > { %v1580_v1 = vadd.f32 %v1325_v63, %v870_v37  ;;  %v886_v37 = vadd.f32 %v2601_v50, %v2647_v32 }
 0x22e   : > { %v1441_v27 = vpop.f32.mrf.mxu0 }
 0x22f   : > { %1644 = vst [vmem:[%s2649_s26 + $0x120] sm:$0xff] %v1580_v1  ;;  %v1583_v24 = vadd.f32 %v1441_v27, %v873_v36 }
 0x231   : > { %1647 = vst [vmem:[%s2649_s26 + $0x138] sm:$0xff] %v1583_v24  ;;  %v816_v46 = vpop.f32.mrf.mxu1 }
 0x232   : > { %v887_v47 = vadd.f32 %v816_v46, %v2639_v38 }
 0x234   : > { %v1328_v35 = vpop.f32.mrf.mxu3 }
 0x235   : > { %v1582_v59 = vadd.f32 %v1328_v35, %v872_v8 }
 0x236   : > { %v1444_v51 = vpop.f32.mrf.mxu0 }
 0x237   : > { %1646 = vst [vmem:[%s2649_s26 + $0x130] sm:$0xff] %v1582_v59  ;;  %v1585_v16 = vadd.f32 %v1444_v51, %v875_v52  ;;  %v890_v51 = vadd.f32 %v2617_v62, %v2647_v32 }
 0x239   : > { %1649 = vst [vmem:[%s2649_s26 + $0x148] sm:$0xff] %v1585_v16  ;;  %v819_v53 = vpop.f32.mrf.mxu1 }
 0x23a   : > { %v889_v36 = vadd.f32 %v819_v53, %v2639_v38 }
 0x23c   : > { %v1331_v22 = vpop.f32.mrf.mxu3 }
 0x23d   : > { %v1584_v11 = vadd.f32 %v1331_v22, %v874_v7 }
 0x23e   : > { %v1447_v0 = vpop.f32.mrf.mxu0 }
 0x23f   : > { %1648 = vst [vmem:[%s2649_s26 + $0x140] sm:$0xff] %v1584_v11  ;;  %v1587_v2 = vadd.f32 %v1447_v0, %v877_v30  ;;  %v892_v11 = vadd.f32 %v2624_v6, %v2647_v32 }
 0x241   : > { %1651 = vst [vmem:[%s2649_s26 + $0x158] sm:$0xff] %v1587_v2  ;;  %v822_v41 = vpop.f32.mrf.mxu1 }
 0x242   : > { %v891_v24 = vadd.f32 %v822_v41, %v2639_v38 }
 0x244   : > { %v1334_v42 = vpop.f32.mrf.mxu3 }
 0x245   : > { %v1586_v33 = vadd.f32 %v1334_v42, %v876_v45  ;;  %v894_v42 = vadd.f32 %v2631_v10, %v2647_v32  ;;  %v896_v10 = vadd.f32 %v2642_v40, %v2647_v32 }
 0x246   : > { %v1450_v13 = vpop.f32.mrf.mxu0 }
 0x247   : > { %1650 = vst [vmem:[%s2649_s26 + $0x150] sm:$0xff] %v1586_v33  ;;  %v1589_v17 = vadd.f32 %v1450_v13, %v879_v26 }
 0x249   : > { %1653 = vst [vmem:[%s2649_s26 + $0x168] sm:$0xff] %v1589_v17  ;;  %v825_v52 = vpop.f32.mrf.mxu1 }
 0x24a   : > { %v893_v16 = vadd.f32 %v825_v52, %v2639_v38 }
 0x24c   : > { %v1337_v5 = vpop.f32.mrf.mxu3 }
 0x24d   : > { %v1588_v39 = vadd.f32 %v1337_v5, %v878_v20 }
 0x24e   : > { %v1453_v14 = vpop.f32.mrf.mxu0 }
 0x24f   : > { %1652 = vst [vmem:[%s2649_s26 + $0x160] sm:$0xff] %v1588_v39  ;;  %v1591_v54 = vadd.f32 %v1453_v14, %v881_v44 }
 0x251   : > { %1655 = vst [vmem:[%s2649_s26 + $0x178] sm:$0xff] %v1591_v54  ;;  %v828_v30 = vpop.f32.mrf.mxu1 }
 0x252   : > { %v895_v0 = vadd.f32 %v828_v30, %v2639_v38 }
 0x254   : > { %v1340_v28 = vpop.f32.mrf.mxu3 }
 0x255   : > { %v1590_v29 = vadd.f32 %v1340_v28, %v880_v23 }
 0x256   : > { %v1456_v18 = vpop.f32.mrf.mxu0 }
 0x257   : > { %1654 = vst [vmem:[%s2649_s26 + $0x170] sm:$0xff] %v1590_v29  ;;  %v1593_v48 = vadd.f32 %v1456_v18, %v883_v61 }
 0x259   : > { %1657 = vst [vmem:[%s2649_s26 + $0x188] sm:$0xff] %v1593_v48  ;;  %v831_v26 = vpop.f32.mrf.mxu1 }
 0x25a   : > { %v897_v33 = vadd.f32 %v831_v26, %v2639_v38 }
 0x25c   : > { %v1343_v55 = vpop.f32.mrf.mxu3 }
 0x25d   : > { %v1592_v58 = vadd.f32 %v1343_v55, %v882_v9 }
 0x25e   : > { %v1459_v34 = vpop.f32.mrf.mxu0 }
 0x25f   : > { %1656 = vst [vmem:[%s2649_s26 + $0x180] sm:$0xff] %v1592_v58  ;;  %v1595_v4 = vadd.f32 %v1459_v34, %v885_v31 }
 0x261   : > { %1659 = vst [vmem:[%s2649_s26 + $0x198] sm:$0xff] %v1595_v4 }
 0x264   : > { %v1346_v21 = vpop.f32.mrf.mxu3 }
 0x265   : > { %v1594_v12 = vadd.f32 %v1346_v21, %v884_v3 }
 0x266   : > { %v1462_v25 = vpop.f32.mrf.mxu0 }
 0x267   : > { %1658 = vst [vmem:[%s2649_s26 + $0x190] sm:$0xff] %v1594_v12  ;;  %v1597_v15 = vadd.f32 %v1462_v25, %v887_v47 }
 0x269   : > { %1661 = vst [vmem:[%s2649_s26 + $0x1a8] sm:$0xff] %v1597_v15 }
 0x26c   : > { %v1349_v63 = vpop.f32.mrf.mxu3 }
 0x26d   : > { %v1596_v1 = vadd.f32 %v1349_v63, %v886_v37 }
 0x26e   : > { %v1465_v60 = vpop.f32.mrf.mxu0 }
 0x26f   : > { %1660 = vst [vmem:[%s2649_s26 + $0x1a0] sm:$0xff] %v1596_v1  ;;  %v1599_v27 = vadd.f32 %v1465_v60, %v889_v36 }
 0x271   : > { %1663 = vst [vmem:[%s2649_s26 + $0x1b8] sm:$0xff] %v1599_v27 }
 0x274   : > { %v1352_v8 = vpop.f32.mrf.mxu3 }
 0x275   : > { %v1598_v35 = vadd.f32 %v1352_v8, %v888_v19 }
 0x276   : > { %v1468_v50 = vpop.f32.mrf.mxu0 }
 0x277   : > { %1662 = vst [vmem:[%s2649_s26 + $0x1b0] sm:$0xff] %v1598_v35  ;;  %v1601_v59 = vadd.f32 %v1468_v50, %v891_v24 }
 0x279   : > { %1665 = vst [vmem:[%s2649_s26 + $0x1c8] sm:$0xff] %v1601_v59 }
 0x27c   : > { %v1355_v43 = vpop.f32.mrf.mxu3 }
 0x27d   : > { %v1600_v7 = vadd.f32 %v1355_v43, %v890_v51 }
 0x27e   : > { %v1471_v57 = vpop.f32.mrf.mxu0 }
 0x27f   : > { %1664 = vst [vmem:[%s2649_s26 + $0x1c0] sm:$0xff] %v1600_v7  ;;  %v1603_v22 = vadd.f32 %v1471_v57, %v893_v16 }
 0x281   : > { %1667 = vst [vmem:[%s2649_s26 + $0x1d8] sm:$0xff] %v1603_v22 }
 0x284   : > { %v1358_v2 = vpop.f32.mrf.mxu3 }
 0x285   : > { %v1602_v62 = vadd.f32 %v1358_v2, %v892_v11 }
 0x286   : > { %v1474_v56 = vpop.f32.mrf.mxu0 }
 0x287   : > { %1666 = vst [vmem:[%s2649_s26 + $0x1d0] sm:$0xff] %v1602_v62  ;;  %v1605_v45 = vadd.f32 %v1474_v56, %v895_v0 }
 0x289   : > { %1669 = vst [vmem:[%s2649_s26 + $0x1e8] sm:$0xff] %v1605_v45 }
 0x28c   : > { %v1361_v6 = vpop.f32.mrf.mxu3 }
 0x28d   : > { %v1604_v13 = vadd.f32 %v1361_v6, %v894_v42 }
 0x28e   : > { %v1477_v17 = vpop.f32.mrf.mxu0 }
 0x28f   : > { %1668 = vst [vmem:[%s2649_s26 + $0x1e0] sm:$0xff] %v1604_v13  ;;  %v1607_v20 = vadd.f32 %v1477_v17, %v897_v33 }
 0x291   : > { %1671 = vst [vmem:[%s2649_s26 + $0x1f8] sm:$0xff] %v1607_v20 }
 0x294   : > { %v1364_v38 = vpop.f32.mrf.mxu3 }
 0x295   : > { %v1606_v44 = vadd.f32 %v1364_v38, %v896_v10 }
 0x297   : > { %1670 = vst [vmem:[%s2649_s26 + $0x1f0] sm:$0xff] %v1606_v44 }
 0x298   : > { %2150 = shalt.err (!%p2147_p0)
}
 0x299   : > { %s2222_s13 = smov 256   ;;  %s2223_s1 = smov 16  }
 0x29a   : > { %1918 = dma.vmem_to_hbm [thread:$0]  (%p2346_p3), %s1689_s24, 8192, %s1691_s11, %s1673_s21, %s2222_s13, %s2222_s13, %s2223_s1  }
 0x29b PF: > { %s1705_s2 = sand.u32 1, %s2193_s18   ;;  %p1935_p5 = pnand %p1837_p11, %p2303_p6 }
 0x29c   : > { %s1706_s3 = scalar_lea.sflag [#allocation6], %s1705_s2 }
 0x29d   : > { %p1936_p7 = pneg %p1935_p5 }
 0x29f   : > { %2188 = dma.done.wait (%p1936_p7), %s1706_s3, 8192  }
 0x2a0   : > { %2190 = vsyncadd (%p1936_p7), %s1706_s3, 4294959104  ;;  %s23_s23 = sadd.s32 1, %s2213_s23   ;;  %s2884_s18 = smov %s2197_s19 }
 0x2a1   : > { %p20_p9 = scmp.ge.s32.totalorder %s23_s23, 4   ;;  %s2885_s19 = smov %s2201_s20 }
 0x2a2   : > { %s2886_s20 = smov %s2362_s27  ;;  %s2887_s21 = smov %s2209_s22 }
 0x2a3   : > { %s2888_s22 = smov %s2890_s17  ;;  %22 = sbr.rel (!%p20_p9) target bundleno = 12 (0xc), region = 111 }
 0x2a8   :  { %1712 = vsyncpa [#allocation5], 1 }
 0x2a9   :  { %1714 = vsyncpa [#allocation5 + $0x1], 1 }
 0x2aa   :  { %1715 = vsyncpa [#allocation8], 1 }
 0x2ab   :  { %1716 = vsyncpa [#allocation11], 1 }
 0x2ac   :  { %1717 = vsyncpa [#allocation6], 1 }
 0x2ad   :  { %1719 = vsyncpa [#allocation6 + $0x1], 1 }

</bundles_post_ra>
